<compile_context>
chip_gen: v7x
topology: tpu7x:2x2x1
jax: 0.10.0
libtpu: 0.0.40
codegen_flags: <defaults>
</compile_context>

<pallas_src>
import jax
import jax.numpy as jnp
from jax.experimental import pallas as pl
from jax.experimental.pallas import tpu as pltpu


def _make_lstm_kernel(T, Bp, H):
    G = 4 * H

    def kernel(x_ref, wih0_ref, b0_ref, whh0_ref, wih1_ref, whh1_ref, b1_ref,
               wfc_ref, bfc_ref, o_ref, xg_ref):
        """Full 2-layer LSTM + FC + sigmoid, single invocation.

        x_ref   : (T*Bp, I) bf16   time-major, batch-padded input
        wih0_ref: (I, 4H)  bf16    layer-0 input weight   (gates [i,f,o,g])
        b0_ref  : (1, 4H)  f32     layer-0 bias (b_ih + b_hh)
        whh0_ref: (H, 4H)  bf16    layer-0 recurrent weight
        wih1_ref: (H, 4H)  bf16    layer-1 input weight
        whh1_ref: (H, 4H)  bf16    layer-1 recurrent weight
        b1_ref  : (1, 4H)  f32     layer-1 bias (b_ih + b_hh)
        wfc_ref : (H, O)   bf16    fc weight;  bfc_ref: (1, O) f32
        o_ref   : (Bp, O)  f32     sigmoid(fc(h2_T))
        xg_ref  : (T*Bp, 4H) f32   VMEM scratch for the input projection
        """
        # ---- Prologue: layer-0 input projection for ALL timesteps, once. ----
        # Stored to VMEM scratch so it is NOT held live in vregs across the
        # unrolled time loop; per-step reads are static-offset vld ops.
        # (Padded batch rows pick up b0 here, but rows are independent and the
        # padded rows are sliced off in the wrapper, so this is harmless.)
        xg = jnp.dot(x_ref[...], wih0_ref[...],
                     preferred_element_type=jnp.float32)
        xg_ref[...] = xg + jnp.broadcast_to(b0_ref[...], (T * Bp, G))

        # Tiny weights loaded once (bf16, reused every timestep).
        whh0 = whh0_ref[...]
        wih1 = wih1_ref[...]
        whh1 = whh1_ref[...]
        # Hoist the bias broadcast (JAX does not CSE broadcast_in_dim in loops).
        b1 = jnp.broadcast_to(b1_ref[...], (Bp, G))

        def activate(gates):
            # Gate columns pre-ordered [i, f, o, g]: one contiguous 3H-wide
            # sigmoid and one H-wide tanh per cell.
            ifo = jax.nn.sigmoid(gates[:, :3 * H])
            g = jnp.tanh(gates[:, 3 * H:])
            return ifo[:, :H], ifo[:, H:2 * H], ifo[:, 2 * H:], g

        h1 = c1 = h2 = c2 = jnp.zeros((Bp, H), jnp.float32)
        h2_bf = h2.astype(jnp.bfloat16)

        # T is small & static: full static unroll gives the scheduler
        # cross-timestep visibility (layer-1 of step t overlaps layer-0 of
        # step t+1; the h2@Whh1 dot of step t only needs step t-1's h2).
        for t in range(T):
            xg_t = xg_ref[pl.ds(t * Bp, Bp), :]            # static-offset load
            gates0 = xg_t + jnp.dot(h1.astype(jnp.bfloat16), whh0,
                                    preferred_element_type=jnp.float32)
            i0, f0, o0, g0 = activate(gates0)
            c1 = f0 * c1 + i0 * g0
            h1 = o0 * jnp.tanh(c1)
            # TODO(synk): nn.LSTM inter-layer dropout (p=0.1) is training-only;
            # omitted (eval semantics).

            # Layer 1: two un-fused dots; the h2 dot is off the serial h1 chain
            # (on v7x both partials accumulate in the MRB for free).
            gates1 = (jnp.dot(h1.astype(jnp.bfloat16), wih1,
                              preferred_element_type=jnp.float32)
                      + jnp.dot(h2_bf, whh1,
                                preferred_element_type=jnp.float32)
                      + b1)
            i1, f1, o1, g1 = activate(gates1)
            c2 = f1 * c2 + i1 * g1
            h2 = o1 * jnp.tanh(c2)
            h2_bf = h2.astype(jnp.bfloat16)

        # FC + sigmoid on the last timestep's layer-1 hidden state.
        logits = (jnp.dot(h2_bf, wfc_ref[...],
                          preferred_element_type=jnp.float32)
                  + bfc_ref[...])
        o_ref[...] = jax.nn.sigmoid(logits)

    return kernel


def online_lstm_forward(x, params):
    """x: (B, T, input_size) float32  ->  (B, output_size) float32."""
    B, T, I = x.shape
    H = params["whh0"].shape[0]
    O = params["wfc"].shape[1]
    G = 4 * H

    # Pad batch (sublane dim) up to the 8-row vreg granularity.
    Bp = max(8, ((B + 7) // 8) * 8)

    # Cheap layout plumbing only (no wrapper-side projection any more):
    # time-major, batch-padded, flattened, cast to the MXU operand dtype.
    x_tm = jnp.transpose(x, (1, 0, 2))                     # (T, B, I)
    x_tm = jnp.pad(x_tm, ((0, 0), (0, Bp - B), (0, 0)))    # (T, Bp, I)
    x2d = x_tm.reshape(T * Bp, I).astype(jnp.bfloat16)     # (T*Bp, I)

    bf = lambda a: a.astype(jnp.bfloat16)
    kernel = _make_lstm_kernel(T, Bp, H)
    vmem = pl.BlockSpec(memory_space=pltpu.MemorySpace.VMEM)

    out = pl.pallas_call(
        kernel,
        out_shape=jax.ShapeDtypeStruct((Bp, O), jnp.float32),
        in_specs=[vmem] * 9,
        out_specs=vmem,
        scratch_shapes=[pltpu.VMEM((T * Bp, G), jnp.float32)],
    )(x2d, bf(params["wih0"]), params["b0"], bf(params["whh0"]),
      bf(params["wih1"]), bf(params["whh1"]), params["b1"],
      bf(params["wfc"]), params["bfc"])
    return out[:B]


def init_params(key, input_size=8, hidden_size=64, output_size=1):
    """Deterministic init in the kernel's layout:
       wih0 (I,4H), whh0 (H,4H), b0 (1,4H)    -- gate columns ordered [i,f,o,g]
       wih1 (H,4H), whh1 (H,4H), b1 (1,4H)    -- biases are b_ih + b_hh
       wfc (H,O), bfc (1,O)."""
    H, I, O = hidden_size, input_size, output_size
    k = 1.0 / jnp.sqrt(jnp.float32(H))
    keys = jax.random.split(key, 10)

    def u(kk, shape):
        return jax.random.uniform(kk, shape, jnp.float32, -k, k)

    return {
        "wih0": u(keys[0], (I, 4 * H)),
        "whh0": u(keys[1], (H, 4 * H)),
        "b0":   u(keys[2], (1, 4 * H)) + u(keys[3], (1, 4 * H)),   # b_ih + b_hh
        "wih1": u(keys[4], (H, 4 * H)),
        "whh1": u(keys[5], (H, 4 * H)),
        "b1":   u(keys[6], (1, 4 * H)) + u(keys[7], (1, 4 * H)),
        "wfc":  u(keys[8], (H, O)),
        "bfc":  u(keys[9], (1, O)),
    }


def reference_forward(x, params):
    """Pure-JAX f32 reference with identical semantics (same [i,f,o,g] layout)."""
    B, T, I = x.shape
    H = params["whh0"].shape[0]

    def split(g):
        return (jax.nn.sigmoid(g[:, 0 * H:1 * H]),   # i
                jax.nn.sigmoid(g[:, 1 * H:2 * H]),   # f
                jax.nn.sigmoid(g[:, 2 * H:3 * H]),   # o
                jnp.tanh(g[:, 3 * H:4 * H]))         # g

    h1 = c1 = h2 = c2 = jnp.zeros((B, H), jnp.float32)
    for t in range(T):
        g0 = x[:, t, :] @ params["wih0"] + h1 @ params["whh0"] + params["b0"]
        i0, f0, o0, gg0 = split(g0)
        c1 = f0 * c1 + i0 * gg0
        h1 = o0 * jnp.tanh(c1)
        g1 = h1 @ params["wih1"] + h2 @ params["whh1"] + params["b1"]
        i1, f1, o1, gg1 = split(g1)
        c2 = f1 * c2 + i1 * gg1
        h2 = o1 * jnp.tanh(c2)
    return jax.nn.sigmoid(h2 @ params["wfc"] + params["bfc"])


if __name__ == "__main__":
    key = jax.random.PRNGKey(0)
    k_x, k_p = jax.random.split(key)

    B, T, I, H, O = 2, 8, 8, 64, 1
    x = jax.random.normal(k_x, (B, T, I), jnp.float32)
    params = init_params(k_p, input_size=I, hidden_size=H, output_size=O)

    out = online_lstm_forward(x, params)
    out = jax.block_until_ready(out)

    ref = reference_forward(x, params)
    assert out.shape == (B, O)
    # Tolerance loosened for bf16 MXU operands (f32 accumulation).
    assert jnp.allclose(out, ref, atol=2e-2, rtol=2e-2), (out, ref)

    print("KERNEL_OK")
</pallas_src>

<mosaic_0001>
module attributes {stable_mosaic.version = 11 : i64} {
  func.func @kernel(%arg0: memref<64x8xbf16, #tpu.memory_space<vmem>>, %arg1: memref<8x256xbf16, #tpu.memory_space<vmem>>, %arg2: memref<1x256xf32, #tpu.memory_space<vmem>>, %arg3: memref<64x256xbf16, #tpu.memory_space<vmem>>, %arg4: memref<64x256xbf16, #tpu.memory_space<vmem>>, %arg5: memref<64x256xbf16, #tpu.memory_space<vmem>>, %arg6: memref<1x256xf32, #tpu.memory_space<vmem>>, %arg7: memref<64x1xbf16, #tpu.memory_space<vmem>>, %arg8: memref<1x1xf32, #tpu.memory_space<vmem>>, %arg9: memref<8x1xf32, #tpu.memory_space<vmem>>, %arg10: memref<64x256xf32, #tpu.memory_space<vmem>>) attributes {dimension_semantics = [], scalar_prefetch = 0 : i64, scratch_operands = 1 : i64, tpu.core_type = #tpu.core_type<tc>} {
    %c0 = arith.constant 0 : index
    %c0_0 = arith.constant 0 : index
    %0 = vector.load %arg0[%c0, %c0_0] : memref<64x8xbf16, #tpu.memory_space<vmem>>, vector<64x8xbf16>
    %c0_1 = arith.constant 0 : index
    %c0_2 = arith.constant 0 : index
    %1 = vector.load %arg1[%c0_1, %c0_2] : memref<8x256xbf16, #tpu.memory_space<vmem>>, vector<8x256xbf16>
    %cst = arith.constant dense<0.000000e+00> : vector<64x256xf32>
    %2 = tpu.matmul %0, %1, %cst {dimension_numbers = #tpu.dot_dimension_numbers<[1], [0], [0], [1], [0, 0, 1, 1], [], []>} : vector<64x8xbf16>, vector<8x256xbf16>, vector<64x256xf32> -> vector<64x256xf32>
    %c0_3 = arith.constant 0 : index
    %c0_4 = arith.constant 0 : index
    %3 = vector.load %arg2[%c0_3, %c0_4] : memref<1x256xf32, #tpu.memory_space<vmem>>, vector<1x256xf32>
    %4 = vector.shape_cast %3 : vector<1x256xf32> to vector<1x256xf32>
    %5 = vector.broadcast %4 : vector<1x256xf32> to vector<64x256xf32>
    %6 = arith.addf %2, %5 : vector<64x256xf32>
    %c0_5 = arith.constant 0 : index
    %c0_6 = arith.constant 0 : index
    %7 = vector.load %arg10[%c0_5, %c0_6] : memref<64x256xf32, #tpu.memory_space<vmem>>, vector<64x256xf32>
    tpu.vector_store %arg10[%c0_5, %c0_6], %6 {strides = array<i32>} : memref<64x256xf32, #tpu.memory_space<vmem>>, vector<64x256xf32>,
    %c0_7 = arith.constant 0 : index
    %c0_8 = arith.constant 0 : index
    %8 = vector.load %arg3[%c0_7, %c0_8] : memref<64x256xbf16, #tpu.memory_space<vmem>>, vector<64x256xbf16>
    %c0_9 = arith.constant 0 : index
    %c0_10 = arith.constant 0 : index
    %9 = vector.load %arg4[%c0_9, %c0_10] : memref<64x256xbf16, #tpu.memory_space<vmem>>, vector<64x256xbf16>
    %c0_11 = arith.constant 0 : index
    %c0_12 = arith.constant 0 : index
    %10 = vector.load %arg5[%c0_11, %c0_12] : memref<64x256xbf16, #tpu.memory_space<vmem>>, vector<64x256xbf16>
    %c0_13 = arith.constant 0 : index
    %c0_14 = arith.constant 0 : index
    %11 = vector.load %arg6[%c0_13, %c0_14] : memref<1x256xf32, #tpu.memory_space<vmem>>, vector<1x256xf32>
    %12 = vector.shape_cast %11 : vector<1x256xf32> to vector<1x256xf32>
    %13 = vector.broadcast %12 : vector<1x256xf32> to vector<8x256xf32>
    %cst_15 = arith.constant 0.000000e+00 : f32
    %14 = vector.broadcast %cst_15 : f32 to vector<8x64xf32>
    %15 = arith.truncf %14 : vector<8x64xf32> to vector<8x64xbf16>
    %c0_16 = arith.constant 0 : index
    %c0_17 = arith.constant 0 : index
    %16 = vector.load %arg10[%c0_16, %c0_17] : memref<64x256xf32, #tpu.memory_space<vmem>>, vector<8x256xf32>
    %17 = arith.truncf %14 : vector<8x64xf32> to vector<8x64xbf16>
    %cst_18 = arith.constant dense<0.000000e+00> : vector<8x256xf32>
    %18 = tpu.matmul %17, %8, %cst_18 {dimension_numbers = #tpu.dot_dimension_numbers<[1], [0], [0], [1], [0, 0, 1, 1], [], []>} : vector<8x64xbf16>, vector<64x256xbf16>, vector<8x256xf32> -> vector<8x256xf32>
    %19 = arith.addf %16, %18 : vector<8x256xf32>
    %20 = vector.extract_strided_slice %19 {offsets = [0, 0], sizes = [8, 192], strides = [1, 1]} : vector<8x256xf32> to vector<8x192xf32>
    %21 = arith.negf %20 : vector<8x192xf32>
    %22 = math.exp %21 : vector<8x192xf32>
    %cst_19 = arith.constant 1.000000e+00 : f32
    %23 = vector.broadcast %cst_19 : f32 to vector<8x192xf32>
    %24 = arith.addf %23, %22 : vector<8x192xf32>
    %25 = arith.divf %23, %24 : vector<8x192xf32>
    %26 = vector.extract_strided_slice %19 {offsets = [0, 192], sizes = [8, 64], strides = [1, 1]} : vector<8x256xf32> to vector<8x64xf32>
    %27 = math.tanh %26 : vector<8x64xf32>
    %28 = vector.extract_strided_slice %25 {offsets = [0, 0], sizes = [8, 64], strides = [1, 1]} : vector<8x192xf32> to vector<8x64xf32>
    %29 = vector.extract_strided_slice %25 {offsets = [0, 64], sizes = [8, 64], strides = [1, 1]} : vector<8x192xf32> to vector<8x64xf32>
    %30 = vector.extract_strided_slice %25 {offsets = [0, 128], sizes = [8, 64], strides = [1, 1]} : vector<8x192xf32> to vector<8x64xf32>
    %31 = arith.mulf %29, %14 : vector<8x64xf32>
    %32 = arith.mulf %28, %27 : vector<8x64xf32>
    %33 = arith.addf %31, %32 : vector<8x64xf32>
    %34 = math.tanh %33 : vector<8x64xf32>
    %35 = arith.mulf %30, %34 : vector<8x64xf32>
    %36 = arith.truncf %35 : vector<8x64xf32> to vector<8x64xbf16>
    %cst_20 = arith.constant dense<0.000000e+00> : vector<8x256xf32>
    %37 = tpu.matmul %36, %9, %cst_20 {dimension_numbers = #tpu.dot_dimension_numbers<[1], [0], [0], [1], [0, 0, 1, 1], [], []>} : vector<8x64xbf16>, vector<64x256xbf16>, vector<8x256xf32> -> vector<8x256xf32>
    %cst_21 = arith.constant dense<0.000000e+00> : vector<8x256xf32>
    %38 = tpu.matmul %15, %10, %cst_21 {dimension_numbers = #tpu.dot_dimension_numbers<[1], [0], [0], [1], [0, 0, 1, 1], [], []>} : vector<8x64xbf16>, vector<64x256xbf16>, vector<8x256xf32> -> vector<8x256xf32>
    %39 = arith.addf %37, %38 : vector<8x256xf32>
    %40 = arith.addf %39, %13 : vector<8x256xf32>
    %41 = vector.extract_strided_slice %40 {offsets = [0, 0], sizes = [8, 192], strides = [1, 1]} : vector<8x256xf32> to vector<8x192xf32>
    %42 = arith.negf %41 : vector<8x192xf32>
    %43 = math.exp %42 : vector<8x192xf32>
    %cst_22 = arith.constant 1.000000e+00 : f32
    %44 = vector.broadcast %cst_22 : f32 to vector<8x192xf32>
    %45 = arith.addf %44, %43 : vector<8x192xf32>
    %46 = arith.divf %44, %45 : vector<8x192xf32>
    %47 = vector.extract_strided_slice %40 {offsets = [0, 192], sizes = [8, 64], strides = [1, 1]} : vector<8x256xf32> to vector<8x64xf32>
    %48 = math.tanh %47 : vector<8x64xf32>
    %49 = vector.extract_strided_slice %46 {offsets = [0, 0], sizes = [8, 64], strides = [1, 1]} : vector<8x192xf32> to vector<8x64xf32>
    %50 = vector.extract_strided_slice %46 {offsets = [0, 64], sizes = [8, 64], strides = [1, 1]} : vector<8x192xf32> to vector<8x64xf32>
    %51 = vector.extract_strided_slice %46 {offsets = [0, 128], sizes = [8, 64], strides = [1, 1]} : vector<8x192xf32> to vector<8x64xf32>
    %52 = arith.mulf %50, %14 : vector<8x64xf32>
    %53 = arith.mulf %49, %48 : vector<8x64xf32>
    %54 = arith.addf %52, %53 : vector<8x64xf32>
    %55 = math.tanh %54 : vector<8x64xf32>
    %56 = arith.mulf %51, %55 : vector<8x64xf32>
    %57 = arith.truncf %56 : vector<8x64xf32> to vector<8x64xbf16>
    %c8 = arith.constant 8 : index
    %c0_23 = arith.constant 0 : index
    %58 = vector.load %arg10[%c8, %c0_23] : memref<64x256xf32, #tpu.memory_space<vmem>>, vector<8x256xf32>
    %59 = arith.truncf %35 : vector<8x64xf32> to vector<8x64xbf16>
    %cst_24 = arith.constant dense<0.000000e+00> : vector<8x256xf32>
    %60 = tpu.matmul %59, %8, %cst_24 {dimension_numbers = #tpu.dot_dimension_numbers<[1], [0], [0], [1], [0, 0, 1, 1], [], []>} : vector<8x64xbf16>, vector<64x256xbf16>, vector<8x256xf32> -> vector<8x256xf32>
    %61 = arith.addf %58, %60 : vector<8x256xf32>
    %62 = vector.extract_strided_slice %61 {offsets = [0, 0], sizes = [8, 192], strides = [1, 1]} : vector<8x256xf32> to vector<8x192xf32>
    %63 = arith.negf %62 : vector<8x192xf32>
    %64 = math.exp %63 : vector<8x192xf32>
    %cst_25 = arith.constant 1.000000e+00 : f32
    %65 = vector.broadcast %cst_25 : f32 to vector<8x192xf32>
    %66 = arith.addf %65, %64 : vector<8x192xf32>
    %67 = arith.divf %65, %66 : vector<8x192xf32>
    %68 = vector.extract_strided_slice %61 {offsets = [0, 192], sizes = [8, 64], strides = [1, 1]} : vector<8x256xf32> to vector<8x64xf32>
    %69 = math.tanh %68 : vector<8x64xf32>
    %70 = vector.extract_strided_slice %67 {offsets = [0, 0], sizes = [8, 64], strides = [1, 1]} : vector<8x192xf32> to vector<8x64xf32>
    %71 = vector.extract_strided_slice %67 {offsets = [0, 64], sizes = [8, 64], strides = [1, 1]} : vector<8x192xf32> to vector<8x64xf32>
    %72 = vector.extract_strided_slice %67 {offsets = [0, 128], sizes = [8, 64], strides = [1, 1]} : vector<8x192xf32> to vector<8x64xf32>
    %73 = arith.mulf %71, %33 : vector<8x64xf32>
    %74 = arith.mulf %70, %69 : vector<8x64xf32>
    %75 = arith.addf %73, %74 : vector<8x64xf32>
    %76 = math.tanh %75 : vector<8x64xf32>
    %77 = arith.mulf %72, %76 : vector<8x64xf32>
    %78 = arith.truncf %77 : vector<8x64xf32> to vector<8x64xbf16>
    %cst_26 = arith.constant dense<0.000000e+00> : vector<8x256xf32>
    %79 = tpu.matmul %78, %9, %cst_26 {dimension_numbers = #tpu.dot_dimension_numbers<[1], [0], [0], [1], [0, 0, 1, 1], [], []>} : vector<8x64xbf16>, vector<64x256xbf16>, vector<8x256xf32> -> vector<8x256xf32>
    %cst_27 = arith.constant dense<0.000000e+00> : vector<8x256xf32>
    %80 = tpu.matmul %57, %10, %cst_27 {dimension_numbers = #tpu.dot_dimension_numbers<[1], [0], [0], [1], [0, 0, 1, 1], [], []>} : vector<8x64xbf16>, vector<64x256xbf16>, vector<8x256xf32> -> vector<8x256xf32>
    %81 = arith.addf %79, %80 : vector<8x256xf32>
    %82 = arith.addf %81, %13 : vector<8x256xf32>
    %83 = vector.extract_strided_slice %82 {offsets = [0, 0], sizes = [8, 192], strides = [1, 1]} : vector<8x256xf32> to vector<8x192xf32>
    %84 = arith.negf %83 : vector<8x192xf32>
    %85 = math.exp %84 : vector<8x192xf32>
    %cst_28 = arith.constant 1.000000e+00 : f32
    %86 = vector.broadcast %cst_28 : f32 to vector<8x192xf32>
    %87 = arith.addf %86, %85 : vector<8x192xf32>
    %88 = arith.divf %86, %87 : vector<8x192xf32>
    %89 = vector.extract_strided_slice %82 {offsets = [0, 192], sizes = [8, 64], strides = [1, 1]} : vector<8x256xf32> to vector<8x64xf32>
    %90 = math.tanh %89 : vector<8x64xf32>
    %91 = vector.extract_strided_slice %88 {offsets = [0, 0], sizes = [8, 64], strides = [1, 1]} : vector<8x192xf32> to vector<8x64xf32>
    %92 = vector.extract_strided_slice %88 {offsets = [0, 64], sizes = [8, 64], strides = [1, 1]} : vector<8x192xf32> to vector<8x64xf32>
    %93 = vector.extract_strided_slice %88 {offsets = [0, 128], sizes = [8, 64], strides = [1, 1]} : vector<8x192xf32> to vector<8x64xf32>
    %94 = arith.mulf %92, %54 : vector<8x64xf32>
    %95 = arith.mulf %91, %90 : vector<8x64xf32>
    %96 = arith.addf %94, %95 : vector<8x64xf32>
    %97 = math.tanh %96 : vector<8x64xf32>
    %98 = arith.mulf %93, %97 : vector<8x64xf32>
    %99 = arith.truncf %98 : vector<8x64xf32> to vector<8x64xbf16>
    %c16 = arith.constant 16 : index
    %c0_29 = arith.constant 0 : index
    %100 = vector.load %arg10[%c16, %c0_29] : memref<64x256xf32, #tpu.memory_space<vmem>>, vector<8x256xf32>
    %101 = arith.truncf %77 : vector<8x64xf32> to vector<8x64xbf16>
    %cst_30 = arith.constant dense<0.000000e+00> : vector<8x256xf32>
    %102 = tpu.matmul %101, %8, %cst_30 {dimension_numbers = #tpu.dot_dimension_numbers<[1], [0], [0], [1], [0, 0, 1, 1], [], []>} : vector<8x64xbf16>, vector<64x256xbf16>, vector<8x256xf32> -> vector<8x256xf32>
    %103 = arith.addf %100, %102 : vector<8x256xf32>
    %104 = vector.extract_strided_slice %103 {offsets = [0, 0], sizes = [8, 192], strides = [1, 1]} : vector<8x256xf32> to vector<8x192xf32>
    %105 = arith.negf %104 : vector<8x192xf32>
    %106 = math.exp %105 : vector<8x192xf32>
    %cst_31 = arith.constant 1.000000e+00 : f32
    %107 = vector.broadcast %cst_31 : f32 to vector<8x192xf32>
    %108 = arith.addf %107, %106 : vector<8x192xf32>
    %109 = arith.divf %107, %108 : vector<8x192xf32>
    %110 = vector.extract_strided_slice %103 {offsets = [0, 192], sizes = [8, 64], strides = [1, 1]} : vector<8x256xf32> to vector<8x64xf32>
    %111 = math.tanh %110 : vector<8x64xf32>
    %112 = vector.extract_strided_slice %109 {offsets = [0, 0], sizes = [8, 64], strides = [1, 1]} : vector<8x192xf32> to vector<8x64xf32>
    %113 = vector.extract_strided_slice %109 {offsets = [0, 64], sizes = [8, 64], strides = [1, 1]} : vector<8x192xf32> to vector<8x64xf32>
    %114 = vector.extract_strided_slice %109 {offsets = [0, 128], sizes = [8, 64], strides = [1, 1]} : vector<8x192xf32> to vector<8x64xf32>
    %115 = arith.mulf %113, %75 : vector<8x64xf32>
    %116 = arith.mulf %112, %111 : vector<8x64xf32>
    %117 = arith.addf %115, %116 : vector<8x64xf32>
    %118 = math.tanh %117 : vector<8x64xf32>
    %119 = arith.mulf %114, %118 : vector<8x64xf32>
    %120 = arith.truncf %119 : vector<8x64xf32> to vector<8x64xbf16>
    %cst_32 = arith.constant dense<0.000000e+00> : vector<8x256xf32>
    %121 = tpu.matmul %120, %9, %cst_32 {dimension_numbers = #tpu.dot_dimension_numbers<[1], [0], [0], [1], [0, 0, 1, 1], [], []>} : vector<8x64xbf16>, vector<64x256xbf16>, vector<8x256xf32> -> vector<8x256xf32>
    %cst_33 = arith.constant dense<0.000000e+00> : vector<8x256xf32>
    %122 = tpu.matmul %99, %10, %cst_33 {dimension_numbers = #tpu.dot_dimension_numbers<[1], [0], [0], [1], [0, 0, 1, 1], [], []>} : vector<8x64xbf16>, vector<64x256xbf16>, vector<8x256xf32> -> vector<8x256xf32>
    %123 = arith.addf %121, %122 : vector<8x256xf32>
    %124 = arith.addf %123, %13 : vector<8x256xf32>
    %125 = vector.extract_strided_slice %124 {offsets = [0, 0], sizes = [8, 192], strides = [1, 1]} : vector<8x256xf32> to vector<8x192xf32>
    %126 = arith.negf %125 : vector<8x192xf32>
    %127 = math.exp %126 : vector<8x192xf32>
    %cst_34 = arith.constant 1.000000e+00 : f32
    %128 = vector.broadcast %cst_34 : f32 to vector<8x192xf32>
    %129 = arith.addf %128, %127 : vector<8x192xf32>
    %130 = arith.divf %128, %129 : vector<8x192xf32>
    %131 = vector.extract_strided_slice %124 {offsets = [0, 192], sizes = [8, 64], strides = [1, 1]} : vector<8x256xf32> to vector<8x64xf32>
    %132 = math.tanh %131 : vector<8x64xf32>
    %133 = vector.extract_strided_slice %130 {offsets = [0, 0], sizes = [8, 64], strides = [1, 1]} : vector<8x192xf32> to vector<8x64xf32>
    %134 = vector.extract_strided_slice %130 {offsets = [0, 64], sizes = [8, 64], strides = [1, 1]} : vector<8x192xf32> to vector<8x64xf32>
    %135 = vector.extract_strided_slice %130 {offsets = [0, 128], sizes = [8, 64], strides = [1, 1]} : vector<8x192xf32> to vector<8x64xf32>
    %136 = arith.mulf %134, %96 : vector<8x64xf32>
    %137 = arith.mulf %133, %132 : vector<8x64xf32>
    %138 = arith.addf %136, %137 : vector<8x64xf32>
    %139 = math.tanh %138 : vector<8x64xf32>
    %140 = arith.mulf %135, %139 : vector<8x64xf32>
    %141 = arith.truncf %140 : vector<8x64xf32> to vector<8x64xbf16>
    %c24 = arith.constant 24 : index
    %c0_35 = arith.constant 0 : index
    %142 = vector.load %arg10[%c24, %c0_35] : memref<64x256xf32, #tpu.memory_space<vmem>>, vector<8x256xf32>
    %143 = arith.truncf %119 : vector<8x64xf32> to vector<8x64xbf16>
    %cst_36 = arith.constant dense<0.000000e+00> : vector<8x256xf32>
    %144 = tpu.matmul %143, %8, %cst_36 {dimension_numbers = #tpu.dot_dimension_numbers<[1], [0], [0], [1], [0, 0, 1, 1], [], []>} : vector<8x64xbf16>, vector<64x256xbf16>, vector<8x256xf32> -> vector<8x256xf32>
    %145 = arith.addf %142, %144 : vector<8x256xf32>
    %146 = vector.extract_strided_slice %145 {offsets = [0, 0], sizes = [8, 192], strides = [1, 1]} : vector<8x256xf32> to vector<8x192xf32>
    %147 = arith.negf %146 : vector<8x192xf32>
    %148 = math.exp %147 : vector<8x192xf32>
    %cst_37 = arith.constant 1.000000e+00 : f32
    %149 = vector.broadcast %cst_37 : f32 to vector<8x192xf32>
    %150 = arith.addf %149, %148 : vector<8x192xf32>
    %151 = arith.divf %149, %150 : vector<8x192xf32>
    %152 = vector.extract_strided_slice %145 {offsets = [0, 192], sizes = [8, 64], strides = [1, 1]} : vector<8x256xf32> to vector<8x64xf32>
    %153 = math.tanh %152 : vector<8x64xf32>
    %154 = vector.extract_strided_slice %151 {offsets = [0, 0], sizes = [8, 64], strides = [1, 1]} : vector<8x192xf32> to vector<8x64xf32>
    %155 = vector.extract_strided_slice %151 {offsets = [0, 64], sizes = [8, 64], strides = [1, 1]} : vector<8x192xf32> to vector<8x64xf32>
    %156 = vector.extract_strided_slice %151 {offsets = [0, 128], sizes = [8, 64], strides = [1, 1]} : vector<8x192xf32> to vector<8x64xf32>
    %157 = arith.mulf %155, %117 : vector<8x64xf32>
    %158 = arith.mulf %154, %153 : vector<8x64xf32>
    %159 = arith.addf %157, %158 : vector<8x64xf32>
    %160 = math.tanh %159 : vector<8x64xf32>
    %161 = arith.mulf %156, %160 : vector<8x64xf32>
    %162 = arith.truncf %161 : vector<8x64xf32> to vector<8x64xbf16>
    %cst_38 = arith.constant dense<0.000000e+00> : vector<8x256xf32>
    %163 = tpu.matmul %162, %9, %cst_38 {dimension_numbers = #tpu.dot_dimension_numbers<[1], [0], [0], [1], [0, 0, 1, 1], [], []>} : vector<8x64xbf16>, vector<64x256xbf16>, vector<8x256xf32> -> vector<8x256xf32>
    %cst_39 = arith.constant dense<0.000000e+00> : vector<8x256xf32>
    %164 = tpu.matmul %141, %10, %cst_39 {dimension_numbers = #tpu.dot_dimension_numbers<[1], [0], [0], [1], [0, 0, 1, 1], [], []>} : vector<8x64xbf16>, vector<64x256xbf16>, vector<8x256xf32> -> vector<8x256xf32>
    %165 = arith.addf %163, %164 : vector<8x256xf32>
    %166 = arith.addf %165, %13 : vector<8x256xf32>
    %167 = vector.extract_strided_slice %166 {offsets = [0, 0], sizes = [8, 192], strides = [1, 1]} : vector<8x256xf32> to vector<8x192xf32>
    %168 = arith.negf %167 : vector<8x192xf32>
    %169 = math.exp %168 : vector<8x192xf32>
    %cst_40 = arith.constant 1.000000e+00 : f32
    %170 = vector.broadcast %cst_40 : f32 to vector<8x192xf32>
    %171 = arith.addf %170, %169 : vector<8x192xf32>
    %172 = arith.divf %170, %171 : vector<8x192xf32>
    %173 = vector.extract_strided_slice %166 {offsets = [0, 192], sizes = [8, 64], strides = [1, 1]} : vector<8x256xf32> to vector<8x64xf32>
    %174 = math.tanh %173 : vector<8x64xf32>
    %175 = vector.extract_strided_slice %172 {offsets = [0, 0], sizes = [8, 64], strides = [1, 1]} : vector<8x192xf32> to vector<8x64xf32>
    %176 = vector.extract_strided_slice %172 {offsets = [0, 64], sizes = [8, 64], strides = [1, 1]} : vector<8x192xf32> to vector<8x64xf32>
    %177 = vector.extract_strided_slice %172 {offsets = [0, 128], sizes = [8, 64], strides = [1, 1]} : vector<8x192xf32> to vector<8x64xf32>
    %178 = arith.mulf %176, %138 : vector<8x64xf32>
    %179 = arith.mulf %175, %174 : vector<8x64xf32>
    %180 = arith.addf %178, %179 : vector<8x64xf32>
    %181 = math.tanh %180 : vector<8x64xf32>
    %182 = arith.mulf %177, %181 : vector<8x64xf32>
    %183 = arith.truncf %182 : vector<8x64xf32> to vector<8x64xbf16>
    %c32 = arith.constant 32 : index
    %c0_41 = arith.constant 0 : index
    %184 = vector.load %arg10[%c32, %c0_41] : memref<64x256xf32, #tpu.memory_space<vmem>>, vector<8x256xf32>
    %185 = arith.truncf %161 : vector<8x64xf32> to vector<8x64xbf16>
    %cst_42 = arith.constant dense<0.000000e+00> : vector<8x256xf32>
    %186 = tpu.matmul %185, %8, %cst_42 {dimension_numbers = #tpu.dot_dimension_numbers<[1], [0], [0], [1], [0, 0, 1, 1], [], []>} : vector<8x64xbf16>, vector<64x256xbf16>, vector<8x256xf32> -> vector<8x256xf32>
    %187 = arith.addf %184, %186 : vector<8x256xf32>
    %188 = vector.extract_strided_slice %187 {offsets = [0, 0], sizes = [8, 192], strides = [1, 1]} : vector<8x256xf32> to vector<8x192xf32>
    %189 = arith.negf %188 : vector<8x192xf32>
    %190 = math.exp %189 : vector<8x192xf32>
    %cst_43 = arith.constant 1.000000e+00 : f32
    %191 = vector.broadcast %cst_43 : f32 to vector<8x192xf32>
    %192 = arith.addf %191, %190 : vector<8x192xf32>
    %193 = arith.divf %191, %192 : vector<8x192xf32>
    %194 = vector.extract_strided_slice %187 {offsets = [0, 192], sizes = [8, 64], strides = [1, 1]} : vector<8x256xf32> to vector<8x64xf32>
    %195 = math.tanh %194 : vector<8x64xf32>
    %196 = vector.extract_strided_slice %193 {offsets = [0, 0], sizes = [8, 64], strides = [1, 1]} : vector<8x192xf32> to vector<8x64xf32>
    %197 = vector.extract_strided_slice %193 {offsets = [0, 64], sizes = [8, 64], strides = [1, 1]} : vector<8x192xf32> to vector<8x64xf32>
    %198 = vector.extract_strided_slice %193 {offsets = [0, 128], sizes = [8, 64], strides = [1, 1]} : vector<8x192xf32> to vector<8x64xf32>
    %199 = arith.mulf %197, %159 : vector<8x64xf32>
    %200 = arith.mulf %196, %195 : vector<8x64xf32>
    %201 = arith.addf %199, %200 : vector<8x64xf32>
    %202 = math.tanh %201 : vector<8x64xf32>
    %203 = arith.mulf %198, %202 : vector<8x64xf32>
    %204 = arith.truncf %203 : vector<8x64xf32> to vector<8x64xbf16>
    %cst_44 = arith.constant dense<0.000000e+00> : vector<8x256xf32>
    %205 = tpu.matmul %204, %9, %cst_44 {dimension_numbers = #tpu.dot_dimension_numbers<[1], [0], [0], [1], [0, 0, 1, 1], [], []>} : vector<8x64xbf16>, vector<64x256xbf16>, vector<8x256xf32> -> vector<8x256xf32>
    %cst_45 = arith.constant dense<0.000000e+00> : vector<8x256xf32>
    %206 = tpu.matmul %183, %10, %cst_45 {dimension_numbers = #tpu.dot_dimension_numbers<[1], [0], [0], [1], [0, 0, 1, 1], [], []>} : vector<8x64xbf16>, vector<64x256xbf16>, vector<8x256xf32> -> vector<8x256xf32>
    %207 = arith.addf %205, %206 : vector<8x256xf32>
    %208 = arith.addf %207, %13 : vector<8x256xf32>
    %209 = vector.extract_strided_slice %208 {offsets = [0, 0], sizes = [8, 192], strides = [1, 1]} : vector<8x256xf32> to vector<8x192xf32>
    %210 = arith.negf %209 : vector<8x192xf32>
    %211 = math.exp %210 : vector<8x192xf32>
    %cst_46 = arith.constant 1.000000e+00 : f32
    %212 = vector.broadcast %cst_46 : f32 to vector<8x192xf32>
    %213 = arith.addf %212, %211 : vector<8x192xf32>
    %214 = arith.divf %212, %213 : vector<8x192xf32>
    %215 = vector.extract_strided_slice %208 {offsets = [0, 192], sizes = [8, 64], strides = [1, 1]} : vector<8x256xf32> to vector<8x64xf32>
    %216 = math.tanh %215 : vector<8x64xf32>
    %217 = vector.extract_strided_slice %214 {offsets = [0, 0], sizes = [8, 64], strides = [1, 1]} : vector<8x192xf32> to vector<8x64xf32>
    %218 = vector.extract_strided_slice %214 {offsets = [0, 64], sizes = [8, 64], strides = [1, 1]} : vector<8x192xf32> to vector<8x64xf32>
    %219 = vector.extract_strided_slice %214 {offsets = [0, 128], sizes = [8, 64], strides = [1, 1]} : vector<8x192xf32> to vector<8x64xf32>
    %220 = arith.mulf %218, %180 : vector<8x64xf32>
    %221 = arith.mulf %217, %216 : vector<8x64xf32>
    %222 = arith.addf %220, %221 : vector<8x64xf32>
    %223 = math.tanh %222 : vector<8x64xf32>
    %224 = arith.mulf %219, %223 : vector<8x64xf32>
    %225 = arith.truncf %224 : vector<8x64xf32> to vector<8x64xbf16>
    %c40 = arith.constant 40 : index
    %c0_47 = arith.constant 0 : index
    %226 = vector.load %arg10[%c40, %c0_47] : memref<64x256xf32, #tpu.memory_space<vmem>>, vector<8x256xf32>
    %227 = arith.truncf %203 : vector<8x64xf32> to vector<8x64xbf16>
    %cst_48 = arith.constant dense<0.000000e+00> : vector<8x256xf32>
    %228 = tpu.matmul %227, %8, %cst_48 {dimension_numbers = #tpu.dot_dimension_numbers<[1], [0], [0], [1], [0, 0, 1, 1], [], []>} : vector<8x64xbf16>, vector<64x256xbf16>, vector<8x256xf32> -> vector<8x256xf32>
    %229 = arith.addf %226, %228 : vector<8x256xf32>
    %230 = vector.extract_strided_slice %229 {offsets = [0, 0], sizes = [8, 192], strides = [1, 1]} : vector<8x256xf32> to vector<8x192xf32>
    %231 = arith.negf %230 : vector<8x192xf32>
    %232 = math.exp %231 : vector<8x192xf32>
    %cst_49 = arith.constant 1.000000e+00 : f32
    %233 = vector.broadcast %cst_49 : f32 to vector<8x192xf32>
    %234 = arith.addf %233, %232 : vector<8x192xf32>
    %235 = arith.divf %233, %234 : vector<8x192xf32>
    %236 = vector.extract_strided_slice %229 {offsets = [0, 192], sizes = [8, 64], strides = [1, 1]} : vector<8x256xf32> to vector<8x64xf32>
    %237 = math.tanh %236 : vector<8x64xf32>
    %238 = vector.extract_strided_slice %235 {offsets = [0, 0], sizes = [8, 64], strides = [1, 1]} : vector<8x192xf32> to vector<8x64xf32>
    %239 = vector.extract_strided_slice %235 {offsets = [0, 64], sizes = [8, 64], strides = [1, 1]} : vector<8x192xf32> to vector<8x64xf32>
    %240 = vector.extract_strided_slice %235 {offsets = [0, 128], sizes = [8, 64], strides = [1, 1]} : vector<8x192xf32> to vector<8x64xf32>
    %241 = arith.mulf %239, %201 : vector<8x64xf32>
    %242 = arith.mulf %238, %237 : vector<8x64xf32>
    %243 = arith.addf %241, %242 : vector<8x64xf32>
    %244 = math.tanh %243 : vector<8x64xf32>
    %245 = arith.mulf %240, %244 : vector<8x64xf32>
    %246 = arith.truncf %245 : vector<8x64xf32> to vector<8x64xbf16>
    %cst_50 = arith.constant dense<0.000000e+00> : vector<8x256xf32>
    %247 = tpu.matmul %246, %9, %cst_50 {dimension_numbers = #tpu.dot_dimension_numbers<[1], [0], [0], [1], [0, 0, 1, 1], [], []>} : vector<8x64xbf16>, vector<64x256xbf16>, vector<8x256xf32> -> vector<8x256xf32>
    %cst_51 = arith.constant dense<0.000000e+00> : vector<8x256xf32>
    %248 = tpu.matmul %225, %10, %cst_51 {dimension_numbers = #tpu.dot_dimension_numbers<[1], [0], [0], [1], [0, 0, 1, 1], [], []>} : vector<8x64xbf16>, vector<64x256xbf16>, vector<8x256xf32> -> vector<8x256xf32>
    %249 = arith.addf %247, %248 : vector<8x256xf32>
    %250 = arith.addf %249, %13 : vector<8x256xf32>
    %251 = vector.extract_strided_slice %250 {offsets = [0, 0], sizes = [8, 192], strides = [1, 1]} : vector<8x256xf32> to vector<8x192xf32>
    %252 = arith.negf %251 : vector<8x192xf32>
    %253 = math.exp %252 : vector<8x192xf32>
    %cst_52 = arith.constant 1.000000e+00 : f32
    %254 = vector.broadcast %cst_52 : f32 to vector<8x192xf32>
    %255 = arith.addf %254, %253 : vector<8x192xf32>
    %256 = arith.divf %254, %255 : vector<8x192xf32>
    %257 = vector.extract_strided_slice %250 {offsets = [0, 192], sizes = [8, 64], strides = [1, 1]} : vector<8x256xf32> to vector<8x64xf32>
    %258 = math.tanh %257 : vector<8x64xf32>
    %259 = vector.extract_strided_slice %256 {offsets = [0, 0], sizes = [8, 64], strides = [1, 1]} : vector<8x192xf32> to vector<8x64xf32>
    %260 = vector.extract_strided_slice %256 {offsets = [0, 64], sizes = [8, 64], strides = [1, 1]} : vector<8x192xf32> to vector<8x64xf32>
    %261 = vector.extract_strided_slice %256 {offsets = [0, 128], sizes = [8, 64], strides = [1, 1]} : vector<8x192xf32> to vector<8x64xf32>
    %262 = arith.mulf %260, %222 : vector<8x64xf32>
    %263 = arith.mulf %259, %258 : vector<8x64xf32>
    %264 = arith.addf %262, %263 : vector<8x64xf32>
    %265 = math.tanh %264 : vector<8x64xf32>
    %266 = arith.mulf %261, %265 : vector<8x64xf32>
    %267 = arith.truncf %266 : vector<8x64xf32> to vector<8x64xbf16>
    %c48 = arith.constant 48 : index
    %c0_53 = arith.constant 0 : index
    %268 = vector.load %arg10[%c48, %c0_53] : memref<64x256xf32, #tpu.memory_space<vmem>>, vector<8x256xf32>
    %269 = arith.truncf %245 : vector<8x64xf32> to vector<8x64xbf16>
    %cst_54 = arith.constant dense<0.000000e+00> : vector<8x256xf32>
    %270 = tpu.matmul %269, %8, %cst_54 {dimension_numbers = #tpu.dot_dimension_numbers<[1], [0], [0], [1], [0, 0, 1, 1], [], []>} : vector<8x64xbf16>, vector<64x256xbf16>, vector<8x256xf32> -> vector<8x256xf32>
    %271 = arith.addf %268, %270 : vector<8x256xf32>
    %272 = vector.extract_strided_slice %271 {offsets = [0, 0], sizes = [8, 192], strides = [1, 1]} : vector<8x256xf32> to vector<8x192xf32>
    %273 = arith.negf %272 : vector<8x192xf32>
    %274 = math.exp %273 : vector<8x192xf32>
    %cst_55 = arith.constant 1.000000e+00 : f32
    %275 = vector.broadcast %cst_55 : f32 to vector<8x192xf32>
    %276 = arith.addf %275, %274 : vector<8x192xf32>
    %277 = arith.divf %275, %276 : vector<8x192xf32>
    %278 = vector.extract_strided_slice %271 {offsets = [0, 192], sizes = [8, 64], strides = [1, 1]} : vector<8x256xf32> to vector<8x64xf32>
    %279 = math.tanh %278 : vector<8x64xf32>
    %280 = vector.extract_strided_slice %277 {offsets = [0, 0], sizes = [8, 64], strides = [1, 1]} : vector<8x192xf32> to vector<8x64xf32>
    %281 = vector.extract_strided_slice %277 {offsets = [0, 64], sizes = [8, 64], strides = [1, 1]} : vector<8x192xf32> to vector<8x64xf32>
    %282 = vector.extract_strided_slice %277 {offsets = [0, 128], sizes = [8, 64], strides = [1, 1]} : vector<8x192xf32> to vector<8x64xf32>
    %283 = arith.mulf %281, %243 : vector<8x64xf32>
    %284 = arith.mulf %280, %279 : vector<8x64xf32>
    %285 = arith.addf %283, %284 : vector<8x64xf32>
    %286 = math.tanh %285 : vector<8x64xf32>
    %287 = arith.mulf %282, %286 : vector<8x64xf32>
    %288 = arith.truncf %287 : vector<8x64xf32> to vector<8x64xbf16>
    %cst_56 = arith.constant dense<0.000000e+00> : vector<8x256xf32>
    %289 = tpu.matmul %288, %9, %cst_56 {dimension_numbers = #tpu.dot_dimension_numbers<[1], [0], [0], [1], [0, 0, 1, 1], [], []>} : vector<8x64xbf16>, vector<64x256xbf16>, vector<8x256xf32> -> vector<8x256xf32>
    %cst_57 = arith.constant dense<0.000000e+00> : vector<8x256xf32>
    %290 = tpu.matmul %267, %10, %cst_57 {dimension_numbers = #tpu.dot_dimension_numbers<[1], [0], [0], [1], [0, 0, 1, 1], [], []>} : vector<8x64xbf16>, vector<64x256xbf16>, vector<8x256xf32> -> vector<8x256xf32>
    %291 = arith.addf %289, %290 : vector<8x256xf32>
    %292 = arith.addf %291, %13 : vector<8x256xf32>
    %293 = vector.extract_strided_slice %292 {offsets = [0, 0], sizes = [8, 192], strides = [1, 1]} : vector<8x256xf32> to vector<8x192xf32>
    %294 = arith.negf %293 : vector<8x192xf32>
    %295 = math.exp %294 : vector<8x192xf32>
    %cst_58 = arith.constant 1.000000e+00 : f32
    %296 = vector.broadcast %cst_58 : f32 to vector<8x192xf32>
    %297 = arith.addf %296, %295 : vector<8x192xf32>
    %298 = arith.divf %296, %297 : vector<8x192xf32>
    %299 = vector.extract_strided_slice %292 {offsets = [0, 192], sizes = [8, 64], strides = [1, 1]} : vector<8x256xf32> to vector<8x64xf32>
    %300 = math.tanh %299 : vector<8x64xf32>
    %301 = vector.extract_strided_slice %298 {offsets = [0, 0], sizes = [8, 64], strides = [1, 1]} : vector<8x192xf32> to vector<8x64xf32>
    %302 = vector.extract_strided_slice %298 {offsets = [0, 64], sizes = [8, 64], strides = [1, 1]} : vector<8x192xf32> to vector<8x64xf32>
    %303 = vector.extract_strided_slice %298 {offsets = [0, 128], sizes = [8, 64], strides = [1, 1]} : vector<8x192xf32> to vector<8x64xf32>
    %304 = arith.mulf %302, %264 : vector<8x64xf32>
    %305 = arith.mulf %301, %300 : vector<8x64xf32>
    %306 = arith.addf %304, %305 : vector<8x64xf32>
    %307 = math.tanh %306 : vector<8x64xf32>
    %308 = arith.mulf %303, %307 : vector<8x64xf32>
    %309 = arith.truncf %308 : vector<8x64xf32> to vector<8x64xbf16>
    %c56 = arith.constant 56 : index
    %c0_59 = arith.constant 0 : index
    %310 = vector.load %arg10[%c56, %c0_59] : memref<64x256xf32, #tpu.memory_space<vmem>>, vector<8x256xf32>
    %311 = arith.truncf %287 : vector<8x64xf32> to vector<8x64xbf16>
    %cst_60 = arith.constant dense<0.000000e+00> : vector<8x256xf32>
    %312 = tpu.matmul %311, %8, %cst_60 {dimension_numbers = #tpu.dot_dimension_numbers<[1], [0], [0], [1], [0, 0, 1, 1], [], []>} : vector<8x64xbf16>, vector<64x256xbf16>, vector<8x256xf32> -> vector<8x256xf32>
    %313 = arith.addf %310, %312 : vector<8x256xf32>
    %314 = vector.extract_strided_slice %313 {offsets = [0, 0], sizes = [8, 192], strides = [1, 1]} : vector<8x256xf32> to vector<8x192xf32>
    %315 = arith.negf %314 : vector<8x192xf32>
    %316 = math.exp %315 : vector<8x192xf32>
    %cst_61 = arith.constant 1.000000e+00 : f32
    %317 = vector.broadcast %cst_61 : f32 to vector<8x192xf32>
    %318 = arith.addf %317, %316 : vector<8x192xf32>
    %319 = arith.divf %317, %318 : vector<8x192xf32>
    %320 = vector.extract_strided_slice %313 {offsets = [0, 192], sizes = [8, 64], strides = [1, 1]} : vector<8x256xf32> to vector<8x64xf32>
    %321 = math.tanh %320 : vector<8x64xf32>
    %322 = vector.extract_strided_slice %319 {offsets = [0, 0], sizes = [8, 64], strides = [1, 1]} : vector<8x192xf32> to vector<8x64xf32>
    %323 = vector.extract_strided_slice %319 {offsets = [0, 64], sizes = [8, 64], strides = [1, 1]} : vector<8x192xf32> to vector<8x64xf32>
    %324 = vector.extract_strided_slice %319 {offsets = [0, 128], sizes = [8, 64], strides = [1, 1]} : vector<8x192xf32> to vector<8x64xf32>
    %325 = arith.mulf %323, %285 : vector<8x64xf32>
    %326 = arith.mulf %322, %321 : vector<8x64xf32>
    %327 = arith.addf %325, %326 : vector<8x64xf32>
    %328 = math.tanh %327 : vector<8x64xf32>
    %329 = arith.mulf %324, %328 : vector<8x64xf32>
    %330 = arith.truncf %329 : vector<8x64xf32> to vector<8x64xbf16>
    %cst_62 = arith.constant dense<0.000000e+00> : vector<8x256xf32>
    %331 = tpu.matmul %330, %9, %cst_62 {dimension_numbers = #tpu.dot_dimension_numbers<[1], [0], [0], [1], [0, 0, 1, 1], [], []>} : vector<8x64xbf16>, vector<64x256xbf16>, vector<8x256xf32> -> vector<8x256xf32>
    %cst_63 = arith.constant dense<0.000000e+00> : vector<8x256xf32>
    %332 = tpu.matmul %309, %10, %cst_63 {dimension_numbers = #tpu.dot_dimension_numbers<[1], [0], [0], [1], [0, 0, 1, 1], [], []>} : vector<8x64xbf16>, vector<64x256xbf16>, vector<8x256xf32> -> vector<8x256xf32>
    %333 = arith.addf %331, %332 : vector<8x256xf32>
    %334 = arith.addf %333, %13 : vector<8x256xf32>
    %335 = vector.extract_strided_slice %334 {offsets = [0, 0], sizes = [8, 192], strides = [1, 1]} : vector<8x256xf32> to vector<8x192xf32>
    %336 = arith.negf %335 : vector<8x192xf32>
    %337 = math.exp %336 : vector<8x192xf32>
    %cst_64 = arith.constant 1.000000e+00 : f32
    %338 = vector.broadcast %cst_64 : f32 to vector<8x192xf32>
    %339 = arith.addf %338, %337 : vector<8x192xf32>
    %340 = arith.divf %338, %339 : vector<8x192xf32>
    %341 = vector.extract_strided_slice %334 {offsets = [0, 192], sizes = [8, 64], strides = [1, 1]} : vector<8x256xf32> to vector<8x64xf32>
    %342 = math.tanh %341 : vector<8x64xf32>
    %343 = vector.extract_strided_slice %340 {offsets = [0, 0], sizes = [8, 64], strides = [1, 1]} : vector<8x192xf32> to vector<8x64xf32>
    %344 = vector.extract_strided_slice %340 {offsets = [0, 64], sizes = [8, 64], strides = [1, 1]} : vector<8x192xf32> to vector<8x64xf32>
    %345 = vector.extract_strided_slice %340 {offsets = [0, 128], sizes = [8, 64], strides = [1, 1]} : vector<8x192xf32> to vector<8x64xf32>
    %346 = arith.mulf %344, %306 : vector<8x64xf32>
    %347 = arith.mulf %343, %342 : vector<8x64xf32>
    %348 = arith.addf %346, %347 : vector<8x64xf32>
    %349 = math.tanh %348 : vector<8x64xf32>
    %350 = arith.mulf %345, %349 : vector<8x64xf32>
    %351 = arith.truncf %350 : vector<8x64xf32> to vector<8x64xbf16>
    %c0_65 = arith.constant 0 : index
    %c0_66 = arith.constant 0 : index
    %352 = vector.load %arg7[%c0_65, %c0_66] : memref<64x1xbf16, #tpu.memory_space<vmem>>, vector<64x1xbf16>
    %cst_67 = arith.constant dense<0.000000e+00> : vector<8x1xf32>
    %353 = tpu.matmul %351, %352, %cst_67 {dimension_numbers = #tpu.dot_dimension_numbers<[1], [0], [0], [1], [0, 0, 1, 1], [], []>} : vector<8x64xbf16>, vector<64x1xbf16>, vector<8x1xf32> -> vector<8x1xf32>
    %c0_68 = arith.constant 0 : index
    %c0_69 = arith.constant 0 : index
    %354 = vector.load %arg8[%c0_68, %c0_69] : memref<1x1xf32, #tpu.memory_space<vmem>>, vector<1x1xf32>
    %355 = vector.broadcast %354 : vector<1x1xf32> to vector<8x1xf32>
    %356 = arith.addf %353, %355 : vector<8x1xf32>
    %357 = arith.negf %356 : vector<8x1xf32>
    %358 = math.exp %357 : vector<8x1xf32>
    %cst_70 = arith.constant 1.000000e+00 : f32
    %359 = vector.broadcast %cst_70 : f32 to vector<8x1xf32>
    %360 = arith.addf %359, %358 : vector<8x1xf32>
    %361 = arith.divf %359, %360 : vector<8x1xf32>
    %c0_71 = arith.constant 0 : index
    %c0_72 = arith.constant 0 : index
    %362 = vector.load %arg9[%c0_71, %c0_72] : memref<8x1xf32, #tpu.memory_space<vmem>>, vector<8x1xf32>
    tpu.vector_store %arg9[%c0_71, %c0_72], %361 {strides = array<i32>} : memref<8x1xf32, #tpu.memory_space<vmem>>, vector<8x1xf32>,
    return
  }
}

</mosaic_0001>

<bundles_post_ra>
// kernel: tpu_custom_call.1
= control target key start
LH: loop header
LB: loop body
LE: loop exit
PB: predicated region body
PF: predicated region fallthrough
CT: control target
= control target key end

     0   :  { %s3194_s0 = inlined_call_operand.vmem [shape: bf16[64,8], index: 0, kind: input, shape index: {}]   ;;  %s3195_s1 = inlined_call_operand.vmem [shape: bf16[8,256], index: 1, kind: input, shape index: {}]   ;;  %s3196_s2 = inlined_call_operand.vmem [shape: f32[1,256], index: 2, kind: input, shape index: {}]   ;;  %s3197_s3 = inlined_call_operand.vmem [shape: bf16[64,256], index: 3, kind: input, shape index: {}]   ;;  %s3198_s4 = inlined_call_operand.hbm [shape: bf16[64,256], index: 4, kind: input, shape index: {}]   ;;  %s3199_s5 = inlined_call_operand.hbm [shape: bf16[64,256], index: 5, kind: input, shape index: {}]   ;;  %s3200_s6 = inlined_call_operand.vmem [shape: f32[1,256], index: 6, kind: input, shape index: {}]   ;;  %s3201_s7 = inlined_call_operand.vmem [shape: bf16[64,1], index: 7, kind: input, shape index: {}]   ;;  %s3202_s8 = inlined_call_operand.<no memory space> [shape: f32[1,1], index: 8, kind: input, shape index: {}]   ;;  %s3203_s9 = inlined_call_operand.vmem [shape: f32[8,1], index: 9, kind: output, shape index: {}]  }
   0x1   :  { %v14_v0 = vstv %s3202_s8 }
   0x2   :  { %15 = vst [vmem:[#allocation3] sm:$0x1] %v14_v0 }
   0x3   :  { %16 = vsyncpa [#allocation5], 0 }
   0x4   :  { %17 = vsyncpa [#allocation7], 0  ;;  %s2482_s11 = smov [#allocation4]   ;;  %s2434_s15 = scalar_lea.hbm %s3198_s4, 1024 }
   0x5   :  { %s31_s12 = sshll.u32 %s2482_s11, 4  ;;  %p2435_p0 = scmp.ne.s32.totalorder %s3198_s4, %s2434_s15  ;;  %s32_s12 = int_to_ptr.vmem [resolvable:$true] %s31_s12 }
   0x6   :  { %p2438_p1 = scmp.lt.u32.totalorder %s2434_s15, %s3198_s4 }
   0x8   :  { %p2440_p2 = pnand %p2438_p1, %p2435_p0 }
   0xa   :  { %2443 = shalt.err (!%p2440_p2)
}
   0xb   :  { %s2444_s8 = scalar_lea.vmem %s32_s12, 1024  ;;  %p2449_p4 = scmp.lt.s32.totalorder %s32_s12, %s32_s12 }
   0xc   :  { %p2445_p3 = scmp.ne.s32.totalorder %s32_s12, %s2444_s8  ;;  %p2450_p5 = scmp.lt.s32.totalorder %s2444_s8, %s2444_s8 }
   0xe   :  { %p2451_p6 = por %p2450_p5, %p2449_p4 }
  0x10   :  { %p2452_p7 = pnand %p2451_p6, %p2445_p3 }
  0x12   :  { %2455 = shalt.err (!%p2452_p7)
}
  0x13   :  { %s2483_s20 = smov 128   ;;  %s2484_s21 = smov 8  }
  0x14   :  { %37 = dma.hbm_to_vmem [thread:$0]  %s3198_s4, 1024, %s32_s12, [#allocation5], %s2483_s20, %s2483_s20, %s2484_s21  }
  0x15   :  { %s2485_s24 = smov [#allocation6]   ;;  %s2456_s28 = scalar_lea.hbm %s3199_s5, 1024 }
  0x16   :  { %s43_s25 = sshll.u32 %s2485_s24, 4  ;;  %p2457_p8 = scmp.ne.s32.totalorder %s3199_s5, %s2456_s28  ;;  %s44_s25 = int_to_ptr.vmem [resolvable:$true] %s43_s25 }
  0x17   :  { %p2460_p9 = scmp.lt.u32.totalorder %s2456_s28, %s3199_s5 }
  0x19   :  { %p2462_p10 = pnand %p2460_p9, %p2457_p8 }
  0x1b   :  { %2465 = shalt.err (!%p2462_p10)
}
  0x1c   :  { %s2466_s13 = scalar_lea.vmem %s44_s25, 1024  ;;  %p2471_p12 = scmp.lt.s32.totalorder %s44_s25, %s44_s25 }
  0x1d   :  { %p2467_p11 = scmp.ne.s32.totalorder %s44_s25, %s2466_s13  ;;  %p2472_p13 = scmp.lt.s32.totalorder %s2466_s13, %s2466_s13 }
  0x1f   :  { %p2473_p0 = por %p2472_p13, %p2471_p12 }
  0x21   :  { %p2474_p1 = pnand %p2473_p0, %p2467_p11 }
  0x23   :  { %2477 = shalt.err (!%p2474_p1)
}
  0x24   :  { %49 = dma.hbm_to_vmem [thread:$0]  %s3199_s5, 1024, %s44_s25, [#allocation7], %s2483_s20, %s2483_s20, %s2484_s21  }
  0x25   :  { %2478 = dma.done.wait [#allocation5], 1024  }
  0x26   :  { %2479 = vsyncadd [#allocation5], 4294966272 }
  0x27   :  { %2480 = dma.done.wait [#allocation7], 1024  }
  0x28   :  { %2481 = vsyncadd [#allocation7], 4294966272  ;;  %v2486_v1 = vmov 0   ;;  %v2572_v2 = vld [vmem:[%s3197_s3 + $0x4] ss:$8 sps:$4 sm:$0xff]   ;;  %vm122_vm0 = vcmask 1043456   ;;  %v74_v15 = vlaneseq }
  0x29   :  { %161 = vmatprep.mubr.bf16.mxu0 %v2486_v1  ;;  %332 = vmatprep.mubr.bf16.mxu1 %v2486_v1  ;;  %v2577_v3 = vld [vmem:[%s3197_s3] ss:$8 sps:$4 sm:$0xff]   ;;  %v2583_v4 = vld [vmem:[%s3197_s3 + $0x14] ss:$8 sps:$4 sm:$0xff]   ;;  %v2592_v6 = vld [vmem:[%s3197_s3 + $0x10] ss:$8 sps:$4 sm:$0xff]  }
  0x2a   :  { %300 = vmatprep.subr.bf16.mxu1 %v2572_v2  ;;  %v71_v5 = vld [vmem:[%s3195_s1] sm:$0xff]  ;;  %vm109_vm1 = vcmask 64512   ;;  %v2611_v13 = vld [vmem:[%s3197_s3 + $0x34] ss:$8 sps:$4 sm:$0xff]   ;;  %v2619_v14 = vld [vmem:[%s3197_s3 + $0x30] ss:$8 sps:$4 sm:$0xff]  }
  0x2b   :  { %301 = vmatpush1.bf16.msra.mxu1 %v2577_v3  ;;  %v2052_v7 = vcombine.high %v71_v5, %v71_v5  ;;  %v2051_v8 = vcombine.low %v71_v5, %v71_v5  ;;  %v2598_v9 = vld [vmem:[%s3197_s3 + $0x24] ss:$8 sps:$4 sm:$0xff]   ;;  %v2606_v12 = vld [vmem:[%s3197_s3 + $0x20] ss:$8 sps:$4 sm:$0xff]   ;;  %v2627_v16 = vshrl.u32 %v74_v15, 7  ;;  %v2201_v55 = vld [vmem:[%s3194_s0 + $0x10] sm:$0xff]  }
  0x2c   :  { %302 = vmatprep.subr.bf16.mxu1 %v2583_v4  ;;  %v2179_v11 = vld [vmem:[%s3194_s0] sm:$0xff]   ;;  %v2191_v46 = vld [vmem:[%s3194_s0 + $0x8] sm:$0xff]   ;;  %v2672_v48 = vld [vmem:[#allocation6 + $0x10] ss:$8 sps:$4 sm:$0xff]   ;;  %vm296_vm2 = vcmask 523264   ;;  %vm2489_vm3 = vmmov 0  }
  0x2d   :  { %2053 = vmatprep.subr.msk.bf16.mxu0 %vm122_vm0, %v2052_v7  ;;  %v124_v10 = vsel %vm122_vm0, %v2051_v8, 0  ;;  %v76_v17 = vsub.s32 0, %v2627_v16  ;;  %v72_v18 = vld [vmem:[%s3196_s2] sm:$0x3]  ;;  %v80_v19 = vsub.s32 1, %v2627_v16  ;;  %s2487_s2 = smov 64  }
  0x2e   :  { %130 = vmatpush1.bf16.msra.mxu0 %v124_v10  ;;  %v2653_v41 = vld [vmem:[#allocation4 + $0x4] ss:$8 sps:$4 sm:$0xff]   ;;  %v2657_v43 = vld [vmem:[#allocation4] ss:$8 sps:$4 sm:$0xff]   ;;  %v2661_v45 = vld [vmem:[#allocation6 + $0x14] ss:$8 sps:$4 sm:$0xff]  }
  0x2f   :  { %303 = vmatpush1.bf16.msra.mxu1 %v2592_v6  ;;  %v2636_v22 = vrot.slane %v72_v18, %v76_v17  ;;  %v2642_v24 = vrot.slane %v72_v18, %v80_v19  ;;  %v2655_v42 = vld [vmem:[#allocation6 + $0x4] ss:$8 sps:$4 sm:$0xff]   ;;  %v2659_v44 = vld [vmem:[#allocation6] ss:$8 sps:$4 sm:$0xff]   ;;  %498 = vmatprep.subr.bf16.mxu0 %v2653_v41  ;;  %v2668_v47 = vld [vmem:[#allocation4 + $0x14] ss:$8 sps:$4 sm:$0xff]  }
  0x30   :  { %304 = vmatprep.subr.bf16.mxu1 %v2598_v9  ;;  %v2674_v49 = vld [vmem:[#allocation4 + $0x10] ss:$8 sps:$4 sm:$0xff]   ;;  %v2678_v50 = vld [vmem:[#allocation6 + $0x24] ss:$8 sps:$4 sm:$0xff]   ;;  %v2686_v52 = vld [vmem:[#allocation6 + $0x20] ss:$8 sps:$4 sm:$0xff]  }
  0x31   :  { %2054 = vmatmul.mubr.msk.bf16.vlgmr.msra.gmra.mrb[0].mxu0 %vm109_vm1, %v2179_v11  ;;  %v2680_v51 = vld [vmem:[#allocation4 + $0x24] ss:$8 sps:$4 sm:$0xff]   ;;  %v2688_v53 = vld [vmem:[#allocation4 + $0x20] ss:$8 sps:$4 sm:$0xff]   ;;  %v2691_v54 = vld [vmem:[#allocation6 + $0x34] ss:$8 sps:$4 sm:$0xff]  }
  0x32   :  { %171 = vmatprep.mubr.bf16.mxu0 %v2486_v1  ;;  %499 = vmatpush1.bf16.msra.mxu0 %v2657_v43  ;;  %v2697_v56 = vld [vmem:[#allocation4 + $0x34] ss:$8 sps:$4 sm:$0xff]   ;;  %v2700_v57 = vld [vmem:[#allocation6 + $0x30] ss:$8 sps:$4 sm:$0xff]   ;;  %vm2039_vm4 = vcmask 7168  }
  0x33   :  { %305 = vmatpush1.bf16.msra.mxu1 %v2606_v12  ;;  %500 = vmatprep.subr.bf16.mxu0 %v2668_v47  ;;  %v2703_v58 = vld [vmem:[#allocation4 + $0x30] ss:$8 sps:$4 sm:$0xff]  }
  0x34   :  { %306 = vmatprep.subr.bf16.mxu1 %v2611_v13  ;;  %v2206_v59 = vld [vmem:[%s3194_s0 + $0x18] sm:$0xff]  }
  0x36   :  { %501 = vmatpush1.bf16.msra.mxu0 %v2674_v49 }
  0x37   :  { %307 = vmatpush1.bf16.msra.mxu1 %v2619_v14  ;;  %502 = vmatprep.subr.bf16.mxu0 %v2680_v51 }
  0x38   :  { %414 = vmatprep.subr.bf16.mxu1 %v2655_v42 }
  0x39   :  { %2055 = vmatmul.mubr.msk.bf16.gmra.mrb[4].mxu0 %vm109_vm1, %v2191_v46 }
  0x3a   :  { %333 = vmatmul.mubr.bf16.vlgmr.msra.gmra.mrb[0].mxu1 %v2486_v1  ;;  %181 = vmatprep.mubr.bf16.mxu0 %v2486_v1 }
  0x3b   :  { %446 = vmatprep.mubr.bf16.mxu1 %v2486_v1  ;;  %415 = vmatpush1.bf16.msra.mxu1 %v2659_v44 }
  0x3c   :  { %416 = vmatprep.subr.bf16.mxu1 %v2661_v45  ;;  %503 = vmatpush1.bf16.msra.mxu0 %v2688_v53 }
  0x3d   :  { %504 = vmatprep.subr.bf16.mxu0 %v2697_v56 }
  0x3f   :  { %417 = vmatpush1.bf16.msra.mxu1 %v2672_v48 }
  0x40   :  { %418 = vmatprep.subr.bf16.mxu1 %v2678_v50  ;;  %505 = vmatpush1.bf16.msra.mxu0 %v2703_v58 }
  0x41   :  { %2056 = vmatmul.mubr.msk.bf16.gmra.mrb[8].mxu0 %vm109_vm1, %v2201_v55  ;;  %651 = vmatprep.subr.bf16.mxu0 %v2655_v42 }
  0x42   :  { %191 = vmatprep.mubr.bf16.mxu0 %v2486_v1 }
  0x43   :  { %419 = vmatpush1.bf16.msra.mxu1 %v2686_v52 }
  0x44   :  { %420 = vmatprep.subr.bf16.mxu1 %v2691_v54 }
  0x47   :  { %421 = vmatpush1.bf16.msra.mxu1 %v2700_v57 }
  0x48   :  { %574 = vmatprep.subr.bf16.mxu1 %v2572_v2 }
  0x49   :  { %2057 = vmatmul.mubr.msk.bf16.gmra.mrb[12].mxu0 %vm109_vm1, %v2206_v59 }
  0x4a   :  { %447 = vmatmul.mubr.bf16.vlgmr.msra.gmra.mrb[4].mxu1 %v2486_v1  ;;  %530 = vmatprep.mubr.bf16.mxu0 %v2486_v1 }
  0x4b   :  { %575 = vmatpush1.bf16.msra.mxu1 %v2577_v3  ;;  %606 = vmatprep.mubr.bf16.mxu1 %v2486_v1 }
  0x4c   :  { %576 = vmatprep.subr.bf16.mxu1 %v2583_v4 }
  0x4f   :  { %577 = vmatpush1.bf16.msra.mxu1 %v2592_v6 }
  0x50   :  { %578 = vmatprep.subr.bf16.mxu1 %v2598_v9 }
  0x53   :  { %579 = vmatpush1.bf16.msra.mxu1 %v2606_v12 }
  0x54   :  { %580 = vmatprep.subr.bf16.mxu1 %v2611_v13 }
  0x57   :  { %581 = vmatpush1.bf16.msra.mxu1 %v2619_v14 }
  0x58   :  { %695 = vmatprep.subr.bf16.mxu1 %v2653_v41 }
 0x104   :  { %v163_v20 = vpop.f32.mrb[0].mxu0 }
 0x105   :  { %v165_v21 = vpop.f32.mrb[1].mxu0  ;;  %v164_v26 = vadd.f32 %v163_v20, %v2636_v22 }
 0x106   :  { %v2638_v23 = vpop.f32.mrb[2].mxu0  ;;  %v166_v27 = vadd.f32 %v165_v21, %v2642_v24 }
 0x107   :  { %v2644_v25 = vpop.f32.mrb[3].mxu0 }
 0x108   :  { %v170_v46 = vadd.f32 %v2644_v25, %v2642_v24 }
 0x10c   :  { %v2733_v5 = vpop.f32.mrb[4].mxu0 }
 0x10d   :  { %v334_v28 = vpop.f32.mrb[0].mxu1  ;;  %v2735_v7 = vpop.f32.mrb[5].mxu0 }
 0x10e   :  { %v341_v29 = vadd.f32 %v334_v28, %v164_v26  ;;  %v336_v30 = vpop.f32.mrb[1].mxu1  ;;  %v2737_v8 = vpop.f32.mrb[6].mxu0 }
 0x10f   :  { %v2648_v31 = vadd.f32 %v336_v30, %v166_v27  ;;  %v338_v32 = vpop.f32.mrb[2].mxu1  ;;  %v2739_v10 = vpop.f32.mrb[7].mxu0 }
 0x110   :  { %v339_v33 = vpop.f32.mrb[3].mxu1  ;;  %v2066_v35 = vmul.f32 -1.442695, %v341_v29 }
 0x111   :  { %2214 = vtanh.f32 %v2648_v31  ;;  %v2067_v0 = vmul.f32 -1.442695, %v2648_v31 }
 0x112   :  { %2216 = vpow2.f32 %v2066_v35 }
 0x114   :  { %v2741_v11 = vpop.f32.mrb[8].mxu0 }
 0x115   :  { %v2743_v15 = vpop.f32.mrb[9].mxu0 }
 0x116   :  { %v2745_v20 = vpop.f32.mrb[10].mxu0 }
 0x117   :  { %v2747_v21 = vpop.f32.mrb[11].mxu0 }
 0x11b   :  { %v2215_v34 = vpop.eup %2214 }
 0x11c   :  { %358 = vrot.lane.b32.xlu0 %v2215_v34, %s2487_s2  ;;  %v2217_v36 = vpop.eup %2216  ;;  %v2749_v30 = vpop.f32.mrb[12].mxu0 }
 0x11d   :  { %v349_v37 = vadd.f32 1.0, %v2217_v36  ;;  %v448_v27 = vpop.f32.mrb[4].mxu1  ;;  %v2751_v32 = vpop.f32.mrb[13].mxu0 }
 0x11e   :  { %v450_v28 = vpop.f32.mrb[5].mxu1  ;;  %v2753_v33 = vpop.f32.mrb[14].mxu0 }
 0x11f   :  { %2218 = vrcp.f32 %v349_v37  ;;  %v452_v29 = vpop.f32.mrb[6].mxu1  ;;  %v2755_v34 = vpop.f32.mrb[15].mxu0 }
 0x120   :  { %v453_v31 = vpop.f32.mrb[7].mxu1 }
 0x129   :  { %v2219_v38 = vpop.eup %2218 }
 0x12a   :  { %v356_v60 = vmul.f32 0.0, %v2219_v38 }
 0x18e   :  { %v359_v39 = vpop.permute.xlu0 %358 }
 0x18f   :  { %v361_v40 = vmul.f32 %v2219_v38, %v359_v39  ;;  %v242_v39 = vld [vmem:[%s3200_s6] sm:$0x3] }
 0x191   :  { %363 = vrot.lane.b32.xlu0 %v361_v40, %s2487_s2  ;;  %v168_v40 = vadd.f32 %v2638_v23, %v2636_v22 }
 0x203   :  { %v364_v61 = vpop.permute.xlu0 %363 }
 0x204   :  { %v2728_v62 = vadd.f32 %v364_v61, %v356_v60  ;;  %v2786_v60 = vrot.slane %v242_v39, %v80_v19  ;;  %v2793_v19 = vrot.slane %v242_v39, %v76_v17 }
 0x206   :  { %2220 = vtanh.f32 %v2728_v62 }
 0x207   :  { %2222 = vpow2.f32 %v2067_v0 }
 0x210   :  { %v2221_v63 = vpop.eup %2220 }
 0x211   :  { %369 = vrot.lane.b32.xlu1 %v2221_v63, %s2487_s2  ;;  %v2223_v18 = vpop.eup %2222 }
 0x212   :  { %v350_v26 = vadd.f32 1.0, %v2223_v18 }
 0x214   :  { %2224 = vrcp.f32 %v350_v26 }
 0x21e   :  { %v2225_v35 = vpop.eup %2224 }
 0x283   :  { %v370_v36 = vpop.permute.xlu1 %369 }
 0x284   :  { %v372_v37 = vmul.f32 %v2225_v35, %v370_v36 }
 0x286   :  { %v373_v38 = vpack.c.bf16 %v372_v37, %v372_v37 }
 0x288   :  { %2084 = vmatmul.mubr.msk.bf16.vlgmr.msra.gmra.mrb[16].mxu0 %vm296_vm2, %v373_v38  ;;  %2087 = vmatmul.mubr.msk.bf16.vlgmr.msra.gmra.mrb[8].mxu1 %vm296_vm2, %v373_v38 }
 0x289   :  { %696 = vmatpush1.bf16.msra.mxu1 %v2657_v43  ;;  %652 = vmatpush1.bf16.msra.mxu0 %v2659_v44 }
 0x28a   :  { %697 = vmatprep.subr.bf16.mxu1 %v2668_v47  ;;  %653 = vmatprep.subr.bf16.mxu0 %v2661_v45 }
 0x28b   :  { %727 = vmatprep.mubr.bf16.mxu1 %v2486_v1  ;;  %683 = vmatprep.mubr.bf16.mxu0 %v2486_v1 }
 0x28d   :  { %698 = vmatpush1.bf16.msra.mxu1 %v2674_v49  ;;  %654 = vmatpush1.bf16.msra.mxu0 %v2672_v48 }
 0x28e   :  { %699 = vmatprep.subr.bf16.mxu1 %v2680_v51  ;;  %655 = vmatprep.subr.bf16.mxu0 %v2678_v50 }
 0x291   :  { %700 = vmatpush1.bf16.msra.mxu1 %v2688_v53  ;;  %656 = vmatpush1.bf16.msra.mxu0 %v2686_v52 }
 0x292   :  { %701 = vmatprep.subr.bf16.mxu1 %v2697_v56  ;;  %657 = vmatprep.subr.bf16.mxu0 %v2691_v54 }
 0x295   :  { %702 = vmatpush1.bf16.msra.mxu1 %v2703_v58  ;;  %658 = vmatpush1.bf16.msra.mxu0 %v2700_v57 }
 0x296   :  { %771 = vmatprep.subr.bf16.mxu0 %v2572_v2  ;;  %848 = vmatprep.subr.bf16.mxu1 %v2655_v42 }
 0x35b   :  { %v532_v55 = vpop.f32.mrb[16].mxu0  ;;  %v608_v59 = vpop.f32.mrb[8].mxu1 }
 0x35c   :  { %v533_v61 = vadd.f32 %v532_v55, %v448_v27  ;;  %v615_v63 = vadd.f32 %v608_v59, %v168_v40  ;;  %v534_v0 = vpop.f32.mrb[17].mxu0  ;;  %v610_v18 = vpop.f32.mrb[9].mxu1 }
 0x35d   :  { %v535_v26 = vadd.f32 %v534_v0, %v450_v28  ;;  %v616_v29 = vadd.f32 %v610_v18, %v170_v46  ;;  %v536_v31 = vpop.f32.mrb[18].mxu0  ;;  %v612_v35 = vpop.f32.mrb[10].mxu1 }
 0x35e   :  { %v537_v36 = vpop.f32.mrb[19].mxu0  ;;  %v613_v37 = vpop.f32.mrb[11].mxu1  ;;  %v539_v27 = vadd.f32 %v533_v61, %v2793_v19  ;;  %v2088_v28 = vmul.f32 -1.442695, %v615_v63 }
 0x35f   :  { %v540_v23 = vadd.f32 %v535_v26, %v2786_v60  ;;  %2226 = vtanh.f32 %v616_v29 }
 0x360   :  { %v2085_v40 = vmul.f32 -1.442695, %v539_v27 }
 0x361   :  { %2228 = vtanh.f32 %v540_v23 }
 0x362   :  { %2230 = vpow2.f32 %v2088_v28  ;;  %v2089_v28 = vmul.f32 -1.442695, %v616_v29 }
 0x363   :  { %2232 = vpow2.f32 %v2085_v40  ;;  %v2086_v40 = vmul.f32 -1.442695, %v540_v23 }
 0x369   :  { %v2227_v25 = vpop.eup %2226 }
 0x36a   :  { %632 = vrot.lane.b32.xlu0 %v2227_v25, %s2487_s2 }
 0x36b   :  { %v2229_v38 = vpop.eup %2228 }
 0x36c   :  { %556 = vrot.lane.b32.xlu1 %v2229_v38, %s2487_s2  ;;  %v2231_v46 = vpop.eup %2230 }
 0x36d   :  { %v2233_v55 = vpop.eup %2232  ;;  %v623_v59 = vadd.f32 1.0, %v2231_v46 }
 0x36e   :  { %v547_v0 = vadd.f32 1.0, %v2233_v55 }
 0x36f   :  { %2234 = vrcp.f32 %v623_v59 }
 0x370   :  { %2236 = vrcp.f32 %v547_v0 }
 0x379   :  { %v2235_v18 = vpop.eup %2234 }
 0x37a   :  { %v2237_v35 = vpop.eup %2236  ;;  %v630_v17 = vmul.f32 %v2235_v18, %v2728_v62 }
 0x37b   :  { %v554_v63 = vmul.f32 0.0, %v2237_v35 }
 0x3dc   :  { %v633_v26 = vpop.permute.xlu0 %632 }
 0x3dd   :  { %v635_v31 = vmul.f32 %v2235_v18, %v633_v26 }
 0x3de   :  { %v557_v36 = vpop.permute.xlu1 %556 }
 0x3df   :  { %v559_v16 = vmul.f32 %v2237_v35, %v557_v36  ;;  %637 = vrot.lane.b32.xlu0 %v635_v31, %s2487_s2 }
 0x3e1   :  { %561 = vrot.lane.b32.xlu1 %v559_v16, %s2487_s2 }
 0x451   :  { %v638_v39 = vpop.permute.xlu0 %637 }
 0x452   :  { %v2799_v61 = vadd.f32 %v638_v39, %v630_v17 }
 0x453   :  { %v562_v37 = vpop.permute.xlu1 %561 }
 0x454   :  { %2238 = vtanh.f32 %v2799_v61  ;;  %v2802_v25 = vadd.f32 %v562_v37, %v554_v63 }
 0x456   :  { %2240 = vtanh.f32 %v2802_v25 }
 0x457   :  { %2242 = vpow2.f32 %v2089_v28 }
 0x458   :  { %2244 = vpow2.f32 %v2086_v40 }
 0x45e   :  { %v2239_v38 = vpop.eup %2238 }
 0x45f   :  { %643 = vrot.lane.b32.xlu0 %v2239_v38, %s2487_s2 }
 0x460   :  { %v2241_v27 = vpop.eup %2240 }
 0x461   :  { %567 = vrot.lane.b32.xlu1 %v2241_v27, %s2487_s2  ;;  %v2243_v62 = vpop.eup %2242 }
 0x462   :  { %v2245_v46 = vpop.eup %2244  ;;  %v624_v55 = vadd.f32 1.0, %v2243_v62 }
 0x463   :  { %v548_v59 = vadd.f32 1.0, %v2245_v46 }
 0x464   :  { %2246 = vrcp.f32 %v624_v55  ;;  %v174_v55 = vadd.f32 %v2733_v5, %v2636_v22 }
 0x465   :  { %2248 = vrcp.f32 %v548_v59 }
 0x46e   :  { %v2247_v0 = vpop.eup %2246 }
 0x46f   :  { %v2249_v31 = vpop.eup %2248 }
 0x4d1   :  { %v644_v18 = vpop.permute.xlu0 %643 }
 0x4d2   :  { %v646_v26 = vmul.f32 %v2247_v0, %v644_v18  ;;  %v176_v0 = vadd.f32 %v2735_v7, %v2642_v24 }
 0x4d3   :  { %v568_v35 = vpop.permute.xlu1 %567 }
 0x4d4   :  { %v647_v36 = vpack.c.bf16 %v646_v26, %v646_v26  ;;  %v570_v16 = vmul.f32 %v2249_v31, %v568_v35 }
 0x4d6   :  { %v571_v17 = vpack.c.bf16 %v570_v16, %v570_v16  ;;  %2091 = vmatmul.mubr.msk.bf16.vlgmr.msra.gmra.mrb[12].mxu1 %vm296_vm2, %v647_v36 }
 0x4d7   :  { %849 = vmatpush1.bf16.msra.mxu1 %v2659_v44  ;;  %880 = vmatprep.mubr.bf16.mxu1 %v2486_v1 }
 0x4d8   :  { %2090 = vmatmul.mubr.msk.bf16.vlgmr.msra.gmra.mrb[20].mxu0 %vm296_vm2, %v571_v17  ;;  %850 = vmatprep.subr.bf16.mxu1 %v2661_v45 }
 0x4d9   :  { %772 = vmatpush1.bf16.msra.mxu0 %v2577_v3  ;;  %803 = vmatprep.mubr.bf16.mxu0 %v2486_v1 }
 0x4da   :  { %773 = vmatprep.subr.bf16.mxu0 %v2583_v4 }
 0x4db   :  { %851 = vmatpush1.bf16.msra.mxu1 %v2672_v48 }
 0x4dc   :  { %852 = vmatprep.subr.bf16.mxu1 %v2678_v50 }
 0x4dd   :  { %774 = vmatpush1.bf16.msra.mxu0 %v2592_v6 }
 0x4de   :  { %775 = vmatprep.subr.bf16.mxu0 %v2598_v9 }
 0x4df   :  { %853 = vmatpush1.bf16.msra.mxu1 %v2686_v52 }
 0x4e0   :  { %854 = vmatprep.subr.bf16.mxu1 %v2691_v54 }
 0x4e1   :  { %776 = vmatpush1.bf16.msra.mxu0 %v2606_v12 }
 0x4e2   :  { %777 = vmatprep.subr.bf16.mxu0 %v2611_v13 }
 0x4e3   :  { %855 = vmatpush1.bf16.msra.mxu1 %v2700_v57 }
 0x4e4   :  { %968 = vmatprep.subr.bf16.mxu1 %v2572_v2 }
 0x4e5   :  { %778 = vmatpush1.bf16.msra.mxu0 %v2619_v14 }
 0x4e6   :  { %892 = vmatprep.subr.bf16.mxu0 %v2653_v41 }
 0x4e8   :  { %2094 = vmatmul.mubr.msk.bf16.vlgmr.msra.gmra.mrb[24].mxu0 %vm296_vm2, %v647_v36 }
 0x4e9   :  { %893 = vmatpush1.bf16.msra.mxu0 %v2657_v43  ;;  %924 = vmatprep.mubr.bf16.mxu0 %v2486_v1 }
 0x4ea   :  { %894 = vmatprep.subr.bf16.mxu0 %v2668_v47 }
 0x4ed   :  { %895 = vmatpush1.bf16.msra.mxu0 %v2674_v49 }
 0x4ee   :  { %896 = vmatprep.subr.bf16.mxu0 %v2680_v51 }
 0x4f1   :  { %897 = vmatpush1.bf16.msra.mxu0 %v2688_v53 }
 0x4f2   :  { %898 = vmatprep.subr.bf16.mxu0 %v2697_v56 }
 0x4f5   :  { %899 = vmatpush1.bf16.msra.mxu0 %v2703_v58 }
 0x4f6   :  { %1045 = vmatprep.subr.bf16.mxu0 %v2655_v42 }
 0x5a9   :  { %v729_v29 = vpop.f32.mrb[12].mxu1 }
 0x5aa   :  { %v731_v23 = vpop.f32.mrb[13].mxu1 }
 0x5ab   :  { %v685_v39 = vpop.f32.mrb[20].mxu0  ;;  %v733_v63 = vpop.f32.mrb[14].mxu1 }
 0x5ac   :  { %v730_v37 = vadd.f32 %v729_v29, %v685_v39  ;;  %v687_v38 = vpop.f32.mrb[21].mxu0  ;;  %v734_v27 = vpop.f32.mrb[15].mxu1 }
 0x5ad   :  { %v732_v28 = vadd.f32 %v731_v23, %v687_v38  ;;  %v689_v40 = vpop.f32.mrb[22].mxu0 }
 0x5ae   :  { %v690_v62 = vpop.f32.mrb[23].mxu0  ;;  %v736_v29 = vadd.f32 %v730_v37, %v2793_v19 }
 0x5af   :  { %v737_v46 = vadd.f32 %v732_v28, %v2786_v60 }
 0x5b0   :  { %v2092_v23 = vmul.f32 -1.442695, %v736_v29 }
 0x5b1   :  { %2250 = vtanh.f32 %v737_v46  ;;  %v2093_v29 = vmul.f32 -1.442695, %v737_v46 }
 0x5bb   :  { %v2251_v59 = vpop.eup %2250  ;;  %v805_v18 = vpop.f32.mrb[24].mxu0 }
 0x5bc   :  { %v812_v26 = vadd.f32 %v805_v18, %v174_v55  ;;  %v807_v31 = vpop.f32.mrb[25].mxu0  ;;  %753 = vrot.lane.b32.xlu1 %v2251_v59, %s2487_s2 }
 0x5bd   :  { %v813_v35 = vadd.f32 %v807_v31, %v176_v0  ;;  %v809_v36 = vpop.f32.mrb[26].mxu0 }
 0x5be   :  { %v810_v16 = vpop.f32.mrb[27].mxu0  ;;  %v2095_v63 = vmul.f32 -1.442695, %v812_v26 }
 0x5bf   :  { %2252 = vtanh.f32 %v813_v35 }
 0x5c0   :  { %2254 = vpow2.f32 %v2092_v23 }
 0x5c9   :  { %v2253_v17 = vpop.eup %2252 }
 0x5ca   :  { %829 = vrot.lane.b32.xlu0 %v2253_v17, %s2487_s2  ;;  %v2255_v5 = vpop.eup %2254 }
 0x5cb   :  { %v744_v39 = vadd.f32 1.0, %v2255_v5  ;;  %v2096_v5 = vmul.f32 -1.442695, %v813_v35 }
 0x5cd   :  { %2256 = vrcp.f32 %v744_v39 }
 0x5ce   :  { %2258 = vpow2.f32 %v2095_v63 }
 0x5d7   :  { %v2257_v7 = vpop.eup %2256 }
 0x5d8   :  { %v2259_v27 = vpop.eup %2258  ;;  %v751_v37 = vmul.f32 %v2257_v7, %v2802_v25 }
 0x5d9   :  { %v820_v40 = vadd.f32 1.0, %v2259_v27 }
 0x5db   :  { %2260 = vrcp.f32 %v820_v40 }
 0x5e5   :  { %v2261_v62 = vpop.eup %2260 }
 0x5e6   :  { %v827_v31 = vmul.f32 %v2261_v62, %v2799_v61 }
 0x62e   :  { %v754_v38 = vpop.permute.xlu1 %753 }
 0x62f   :  { %v756_v28 = vmul.f32 %v2257_v7, %v754_v38 }
 0x631   :  { %758 = vrot.lane.b32.xlu1 %v756_v28, %s2487_s2 }
 0x63c   :  { %v830_v55 = vpop.permute.xlu0 %829 }
 0x63d   :  { %v832_v59 = vmul.f32 %v2261_v62, %v830_v55 }
 0x63f   :  { %834 = vrot.lane.b32.xlu0 %v832_v59, %s2487_s2 }
 0x6a3   :  { %v759_v0 = vpop.permute.xlu1 %758 }
 0x6a4   :  { %v2848_v18 = vadd.f32 %v759_v0, %v751_v37  ;;  %v178_v0 = vadd.f32 %v2737_v8, %v2636_v22 }
 0x6a6   :  { %2262 = vtanh.f32 %v2848_v18 }
 0x6b0   :  { %v2263_v26 = vpop.eup %2262 }
 0x6b1   :  { %764 = vrot.lane.b32.xlu1 %v2263_v26, %s2487_s2  ;;  %v835_v36 = vpop.permute.xlu0 %834  ;;  %v180_v26 = vadd.f32 %v2739_v10, %v2642_v24 }
 0x6b2   :  { %v2853_v16 = vadd.f32 %v835_v36, %v827_v31 }
 0x6b4   :  { %2264 = vtanh.f32 %v2853_v16 }
 0x6b5   :  { %2266 = vpow2.f32 %v2093_v29 }
 0x6be   :  { %v2265_v17 = vpop.eup %2264 }
 0x6bf   :  { %840 = vrot.lane.b32.xlu0 %v2265_v17, %s2487_s2  ;;  %v2267_v25 = vpop.eup %2266 }
 0x6c0   :  { %v745_v23 = vadd.f32 1.0, %v2267_v25 }
 0x6c2   :  { %2268 = vrcp.f32 %v745_v23 }
 0x6c3   :  { %2270 = vpow2.f32 %v2096_v5 }
 0x6cc   :  { %v2269_v39 = vpop.eup %2268 }
 0x6cd   :  { %v2271_v7 = vpop.eup %2270 }
 0x6ce   :  { %v821_v27 = vadd.f32 1.0, %v2271_v7 }
 0x6d0   :  { %2272 = vrcp.f32 %v821_v27 }
 0x6da   :  { %v2273_v46 = vpop.eup %2272 }
 0x723   :  { %v765_v63 = vpop.permute.xlu1 %764 }
 0x724   :  { %v767_v38 = vmul.f32 %v2269_v39, %v765_v63 }
 0x726   :  { %v768_v61 = vpack.c.bf16 %v767_v38, %v767_v38 }
 0x728   :  { %2097 = vmatmul.mubr.msk.bf16.vlgmr.msra.gmra.mrb[16].mxu1 %vm296_vm2, %v768_v61 }
 0x729   :  { %969 = vmatpush1.bf16.msra.mxu1 %v2577_v3  ;;  %1000 = vmatprep.mubr.bf16.mxu1 %v2486_v1 }
 0x72a   :  { %970 = vmatprep.subr.bf16.mxu1 %v2583_v4 }
 0x72d   :  { %971 = vmatpush1.bf16.msra.mxu1 %v2592_v6 }
 0x72e   :  { %972 = vmatprep.subr.bf16.mxu1 %v2598_v9 }
 0x731   :  { %973 = vmatpush1.bf16.msra.mxu1 %v2606_v12  ;;  %v841_v35 = vpop.permute.xlu0 %840 }
 0x732   :  { %974 = vmatprep.subr.bf16.mxu1 %v2611_v13  ;;  %v843_v28 = vmul.f32 %v2273_v46, %v841_v35 }
 0x734   :  { %v844_v40 = vpack.c.bf16 %v843_v28, %v843_v28 }
 0x735   :  { %975 = vmatpush1.bf16.msra.mxu1 %v2619_v14 }
 0x736   :  { %1089 = vmatprep.subr.bf16.mxu1 %v2653_v41  ;;  %2098 = vmatmul.mubr.msk.bf16.vlgmr.msra.gmra.mrb[28].mxu0 %vm296_vm2, %v844_v40 }
 0x737   :  { %1046 = vmatpush1.bf16.msra.mxu0 %v2659_v44  ;;  %1077 = vmatprep.mubr.bf16.mxu0 %v2486_v1 }
 0x738   :  { %2101 = vmatmul.mubr.msk.bf16.vlgmr.msra.gmra.mrb[20].mxu1 %vm296_vm2, %v844_v40  ;;  %1047 = vmatprep.subr.bf16.mxu0 %v2661_v45 }
 0x739   :  { %1090 = vmatpush1.bf16.msra.mxu1 %v2657_v43  ;;  %1121 = vmatprep.mubr.bf16.mxu1 %v2486_v1 }
 0x73a   :  { %1091 = vmatprep.subr.bf16.mxu1 %v2668_v47 }
 0x73b   :  { %1048 = vmatpush1.bf16.msra.mxu0 %v2672_v48 }
 0x73c   :  { %1049 = vmatprep.subr.bf16.mxu0 %v2678_v50 }
 0x73d   :  { %1092 = vmatpush1.bf16.msra.mxu1 %v2674_v49 }
 0x73e   :  { %1093 = vmatprep.subr.bf16.mxu1 %v2680_v51 }
 0x73f   :  { %1050 = vmatpush1.bf16.msra.mxu0 %v2686_v52 }
 0x740   :  { %1051 = vmatprep.subr.bf16.mxu0 %v2691_v54 }
 0x741   :  { %1094 = vmatpush1.bf16.msra.mxu1 %v2688_v53 }
 0x742   :  { %1095 = vmatprep.subr.bf16.mxu1 %v2697_v56 }
 0x743   :  { %1052 = vmatpush1.bf16.msra.mxu0 %v2700_v57 }
 0x744   :  { %1165 = vmatprep.subr.bf16.mxu0 %v2572_v2 }
 0x745   :  { %1096 = vmatpush1.bf16.msra.mxu1 %v2703_v58 }
 0x746   :  { %1242 = vmatprep.subr.bf16.mxu1 %v2655_v42 }
 0x7fb   :  { %v882_v62 = vpop.f32.mrb[16].mxu1 }
 0x7fc   :  { %v884_v55 = vpop.f32.mrb[17].mxu1 }
 0x7fd   :  { %v886_v59 = vpop.f32.mrb[18].mxu1 }
 0x7fe   :  { %v887_v37 = vpop.f32.mrb[19].mxu1 }
 0x809   :  { %v926_v31 = vpop.f32.mrb[28].mxu0 }
 0x80a   :  { %v927_v17 = vadd.f32 %v926_v31, %v882_v62  ;;  %v928_v29 = vpop.f32.mrb[29].mxu0 }
 0x80b   :  { %v1002_v36 = vpop.f32.mrb[20].mxu1  ;;  %v929_v5 = vadd.f32 %v928_v29, %v884_v55  ;;  %v930_v39 = vpop.f32.mrb[30].mxu0 }
 0x80c   :  { %v1009_v25 = vadd.f32 %v1002_v36, %v178_v0  ;;  %v1004_v23 = vpop.f32.mrb[21].mxu1  ;;  %v931_v38 = vpop.f32.mrb[31].mxu0  ;;  %v933_v46 = vadd.f32 %v927_v17, %v2793_v19 }
 0x80d   :  { %v1010_v63 = vadd.f32 %v1004_v23, %v180_v26  ;;  %v1006_v7 = vpop.f32.mrb[22].mxu1  ;;  %v934_v27 = vadd.f32 %v929_v5, %v2786_v60 }
 0x80e   :  { %v1007_v61 = vpop.f32.mrb[23].mxu1  ;;  %v2102_v35 = vmul.f32 -1.442695, %v1009_v25  ;;  %v2099_v28 = vmul.f32 -1.442695, %v933_v46 }
 0x80f   :  { %2274 = vtanh.f32 %v1010_v63 }
 0x810   :  { %2276 = vtanh.f32 %v934_v27 }
 0x811   :  { %2278 = vpow2.f32 %v2102_v35 }
 0x812   :  { %2280 = vpow2.f32 %v2099_v28 }
 0x819   :  { %v2275_v8 = vpop.eup %2274 }
 0x81a   :  { %1026 = vrot.lane.b32.xlu0 %v2275_v8, %s2487_s2  ;;  %v2277_v10 = vpop.eup %2276  ;;  %v2103_v8 = vmul.f32 -1.442695, %v1010_v63 }
 0x81b   :  { %950 = vrot.lane.b32.xlu1 %v2277_v10, %s2487_s2  ;;  %v2279_v40 = vpop.eup %2278 }
 0x81c   :  { %v2281_v62 = vpop.eup %2280  ;;  %v1017_v55 = vadd.f32 1.0, %v2279_v40 }
 0x81d   :  { %v941_v59 = vadd.f32 1.0, %v2281_v62 }
 0x81e   :  { %2282 = vrcp.f32 %v1017_v55 }
 0x81f   :  { %2284 = vrcp.f32 %v941_v59 }
 0x828   :  { %v2283_v37 = vpop.eup %2282 }
 0x829   :  { %v2285_v31 = vpop.eup %2284  ;;  %v1024_v17 = vmul.f32 %v2283_v37, %v2853_v16  ;;  %v2100_v16 = vmul.f32 -1.442695, %v934_v27 }
 0x82a   :  { %v948_v5 = vmul.f32 %v2285_v31, %v2848_v18 }
 0x88c   :  { %v1027_v0 = vpop.permute.xlu0 %1026 }
 0x88d   :  { %v1029_v26 = vmul.f32 %v2283_v37, %v1027_v0  ;;  %v951_v36 = vpop.permute.xlu1 %950 }
 0x88e   :  { %v953_v29 = vmul.f32 %v2285_v31, %v951_v36  ;;  %v184_v36 = vadd.f32 %v2741_v11, %v2636_v22 }
 0x88f   :  { %1031 = vrot.lane.b32.xlu0 %v1029_v26, %s2487_s2 }
 0x890   :  { %955 = vrot.lane.b32.xlu1 %v953_v29, %s2487_s2 }
 0x901   :  { %v1032_v25 = vpop.permute.xlu0 %1031 }
 0x902   :  { %v2898_v23 = vadd.f32 %v1032_v25, %v1024_v17  ;;  %v956_v39 = vpop.permute.xlu1 %955 }
 0x903   :  { %v2902_v7 = vadd.f32 %v956_v39, %v948_v5 }
 0x904   :  { %2286 = vtanh.f32 %v2898_v23 }
 0x905   :  { %2288 = vtanh.f32 %v2902_v7 }
 0x906   :  { %2290 = vpow2.f32 %v2103_v8 }
 0x907   :  { %2292 = vpow2.f32 %v2100_v16 }
 0x90e   :  { %v2287_v38 = vpop.eup %2286 }
 0x90f   :  { %1037 = vrot.lane.b32.xlu0 %v2287_v38, %s2487_s2  ;;  %v2289_v61 = vpop.eup %2288 }
 0x910   :  { %961 = vrot.lane.b32.xlu1 %v2289_v61, %s2487_s2  ;;  %v2291_v10 = vpop.eup %2290 }
 0x911   :  { %v2293_v46 = vpop.eup %2292  ;;  %v1018_v18 = vadd.f32 1.0, %v2291_v10 }
 0x912   :  { %v942_v35 = vadd.f32 1.0, %v2293_v46 }
 0x913   :  { %2294 = vrcp.f32 %v1018_v18 }
 0x914   :  { %2296 = vrcp.f32 %v942_v35 }
 0x91d   :  { %v2295_v28 = vpop.eup %2294 }
 0x91e   :  { %v2297_v55 = vpop.eup %2296 }
 0x981   :  { %v1038_v40 = vpop.permute.xlu0 %1037 }
 0x982   :  { %v1040_v62 = vmul.f32 %v2295_v28, %v1038_v40  ;;  %v962_v59 = vpop.permute.xlu1 %961 }
 0x983   :  { %v964_v0 = vmul.f32 %v2297_v55, %v962_v59 }
 0x984   :  { %v1041_v37 = vpack.c.bf16 %v1040_v62, %v1040_v62 }
 0x985   :  { %v965_v26 = vpack.c.bf16 %v964_v0, %v964_v0 }
 0x986   :  { %2105 = vmatmul.mubr.msk.bf16.vlgmr.msra.gmra.mrb[24].mxu1 %vm296_vm2, %v1041_v37 }
 0x987   :  { %1243 = vmatpush1.bf16.msra.mxu1 %v2659_v44  ;;  %1274 = vmatprep.mubr.bf16.mxu1 %v2486_v1 }
 0x988   :  { %2104 = vmatmul.mubr.msk.bf16.vlgmr.msra.gmra.mrb[32].mxu0 %vm296_vm2, %v965_v26  ;;  %1244 = vmatprep.subr.bf16.mxu1 %v2661_v45 }
 0x989   :  { %1166 = vmatpush1.bf16.msra.mxu0 %v2577_v3  ;;  %1197 = vmatprep.mubr.bf16.mxu0 %v2486_v1 }
 0x98a   :  { %1167 = vmatprep.subr.bf16.mxu0 %v2583_v4 }
 0x98b   :  { %1245 = vmatpush1.bf16.msra.mxu1 %v2672_v48 }
 0x98c   :  { %1246 = vmatprep.subr.bf16.mxu1 %v2678_v50 }
 0x98d   :  { %1168 = vmatpush1.bf16.msra.mxu0 %v2592_v6 }
 0x98e   :  { %1169 = vmatprep.subr.bf16.mxu0 %v2598_v9 }
 0x98f   :  { %1247 = vmatpush1.bf16.msra.mxu1 %v2686_v52 }
 0x990   :  { %1248 = vmatprep.subr.bf16.mxu1 %v2691_v54 }
 0x991   :  { %1170 = vmatpush1.bf16.msra.mxu0 %v2606_v12 }
 0x992   :  { %1171 = vmatprep.subr.bf16.mxu0 %v2611_v13 }
 0x993   :  { %1249 = vmatpush1.bf16.msra.mxu1 %v2700_v57 }
 0x994   :  { %1362 = vmatprep.subr.bf16.mxu1 %v2572_v2 }
 0x995   :  { %1172 = vmatpush1.bf16.msra.mxu0 %v2619_v14 }
 0x996   :  { %1286 = vmatprep.subr.bf16.mxu0 %v2653_v41 }
 0x998   :  { %2108 = vmatmul.mubr.msk.bf16.vlgmr.msra.gmra.mrb[36].mxu0 %vm296_vm2, %v1041_v37 }
 0x999   :  { %1287 = vmatpush1.bf16.msra.mxu0 %v2657_v43  ;;  %1318 = vmatprep.mubr.bf16.mxu0 %v2486_v1 }
 0x99a   :  { %1288 = vmatprep.subr.bf16.mxu0 %v2668_v47 }
 0x99d   :  { %1289 = vmatpush1.bf16.msra.mxu0 %v2674_v49 }
 0x99e   :  { %1290 = vmatprep.subr.bf16.mxu0 %v2680_v51 }
 0x9a1   :  { %1291 = vmatpush1.bf16.msra.mxu0 %v2688_v53 }
 0x9a2   :  { %1292 = vmatprep.subr.bf16.mxu0 %v2697_v56 }
 0x9a5   :  { %1293 = vmatpush1.bf16.msra.mxu0 %v2703_v58 }
 0x9a6   :  { %1439 = vmatprep.subr.bf16.mxu0 %v2655_v42  ;;  %v186_v42 = vadd.f32 %v2743_v15, %v2642_v24 }
 0xa59   :  { %v1123_v2 = vpop.f32.mrb[24].mxu1 }
 0xa5a   :  { %v1125_v3 = vpop.f32.mrb[25].mxu1 }
 0xa5b   :  { %v1079_v4 = vpop.f32.mrb[32].mxu0  ;;  %v1127_v6 = vpop.f32.mrb[26].mxu1 }
 0xa5c   :  { %v1124_v9 = vadd.f32 %v1123_v2, %v1079_v4  ;;  %v1081_v12 = vpop.f32.mrb[33].mxu0  ;;  %v1128_v13 = vpop.f32.mrb[27].mxu1 }
 0xa5d   :  { %v1126_v14 = vadd.f32 %v1125_v3, %v1081_v12  ;;  %v1083_v63 = vpop.f32.mrb[34].mxu0 }
 0xa5e   :  { %v1084_v27 = vpop.f32.mrb[35].mxu0  ;;  %v1130_v16 = vadd.f32 %v1124_v9, %v2793_v19 }
 0xa5f   :  { %v1131_v31 = vadd.f32 %v1126_v14, %v2786_v60 }
 0xa60   :  { %v2106_v10 = vmul.f32 -1.442695, %v1130_v16 }
 0xa61   :  { %2298 = vtanh.f32 %v1131_v31  ;;  %v2107_v13 = vmul.f32 -1.442695, %v1131_v31  ;;  %v2968_v31 = vld [vmem:[%s3197_s3 + $0x14] ss:$8 sps:$4 sm:$0xff]  }
 0xa6b   :  { %v2299_v29 = vpop.eup %2298  ;;  %v1199_v17 = vpop.f32.mrb[36].mxu0 }
 0xa6c   :  { %v1206_v25 = vadd.f32 %v1199_v17, %v184_v36  ;;  %v1201_v5 = vpop.f32.mrb[37].mxu0  ;;  %1147 = vrot.lane.b32.xlu1 %v2299_v29, %s2487_s2 }
 0xa6d   :  { %v1207_v39 = vadd.f32 %v1201_v5, %v186_v42  ;;  %v1203_v38 = vpop.f32.mrb[38].mxu0  ;;  %v2974_v5 = vld [vmem:[%s3197_s3 + $0x10] ss:$8 sps:$4 sm:$0xff]  }
 0xa6e   :  { %v1204_v61 = vpop.f32.mrb[39].mxu0  ;;  %v2109_v18 = vmul.f32 -1.442695, %v1206_v25  ;;  %v2961_v25 = vld [vmem:[%s3197_s3] ss:$8 sps:$4 sm:$0xff]  }
 0xa6f   :  { %2300 = vtanh.f32 %v1207_v39  ;;  %v2110_v63 = vmul.f32 -1.442695, %v1207_v39  ;;  %v2980_v39 = vld [vmem:[%s3197_s3 + $0x24] ss:$8 sps:$4 sm:$0xff]   ;;  %v2986_v38 = vld [vmem:[%s3197_s3 + $0x20] ss:$8 sps:$4 sm:$0xff]  }
 0xa70   :  { %2302 = vpow2.f32 %v2106_v10  ;;  %v2992_v61 = vld [vmem:[%s3197_s3 + $0x34] ss:$8 sps:$4 sm:$0xff]   ;;  %v2998_v10 = vld [vmem:[%s3197_s3 + $0x30] ss:$8 sps:$4 sm:$0xff]  }
 0xa79   :  { %v2301_v8 = vpop.eup %2300 }
 0xa7a   :  { %1223 = vrot.lane.b32.xlu0 %v2301_v8, %s2487_s2  ;;  %v2303_v11 = vpop.eup %2302 }
 0xa7b   :  { %v1138_v46 = vadd.f32 1.0, %v2303_v11 }
 0xa7d   :  { %2304 = vrcp.f32 %v1138_v46 }
 0xa7e   :  { %2306 = vpow2.f32 %v2109_v18 }
 0xa87   :  { %v2305_v15 = vpop.eup %2304 }
 0xa88   :  { %v2307_v28 = vpop.eup %2306  ;;  %v1145_v0 = vmul.f32 %v2305_v15, %v2902_v7 }
 0xa89   :  { %v1214_v62 = vadd.f32 1.0, %v2307_v28 }
 0xa8b   :  { %2308 = vrcp.f32 %v1214_v62 }
 0xa95   :  { %v2309_v55 = vpop.eup %2308 }
 0xa96   :  { %v1221_v4 = vmul.f32 %v2309_v55, %v2898_v23 }
 0xade   :  { %v1148_v35 = vpop.permute.xlu1 %1147 }
 0xadf   :  { %v1150_v40 = vmul.f32 %v2305_v15, %v1148_v35 }
 0xae1   :  { %1152 = vrot.lane.b32.xlu1 %v1150_v40, %s2487_s2 }
 0xaec   :  { %v1224_v59 = vpop.permute.xlu0 %1223 }
 0xaed   :  { %v1226_v37 = vmul.f32 %v2309_v55, %v1224_v59 }
 0xaef   :  { %1228 = vrot.lane.b32.xlu0 %v1226_v37, %s2487_s2 }
 0xb53   :  { %v1153_v26 = vpop.permute.xlu1 %1152 }
 0xb54   :  { %v2948_v2 = vadd.f32 %v1153_v26, %v1145_v0 }
 0xb56   :  { %2310 = vtanh.f32 %v2948_v2 }
 0xb60   :  { %v2311_v3 = vpop.eup %2310 }
 0xb61   :  { %1158 = vrot.lane.b32.xlu1 %v2311_v3, %s2487_s2  ;;  %v1229_v6 = vpop.permute.xlu0 %1228 }
 0xb62   :  { %v2953_v9 = vadd.f32 %v1229_v6, %v1221_v4 }
 0xb64   :  { %2312 = vtanh.f32 %v2953_v9 }
 0xb65   :  { %2314 = vpow2.f32 %v2107_v13 }
 0xb6e   :  { %v2313_v12 = vpop.eup %2312 }
 0xb6f   :  { %1234 = vrot.lane.b32.xlu0 %v2313_v12, %s2487_s2  ;;  %v2315_v7 = vpop.eup %2314 }
 0xb70   :  { %v1139_v14 = vadd.f32 1.0, %v2315_v7 }
 0xb72   :  { %2316 = vrcp.f32 %v1139_v14 }
 0xb73   :  { %2318 = vpow2.f32 %v2110_v63 }
 0xb7c   :  { %v2317_v27 = vpop.eup %2316 }
 0xb7d   :  { %v2319_v29 = vpop.eup %2318 }
 0xb7e   :  { %v1215_v17 = vadd.f32 1.0, %v2319_v29 }
 0xb80   :  { %2320 = vrcp.f32 %v1215_v17 }
 0xb8a   :  { %v2321_v8 = vpop.eup %2320 }
 0xbd3   :  { %v1159_v36 = vpop.permute.xlu1 %1158 }
 0xbd4   :  { %v1161_v42 = vmul.f32 %v2317_v27, %v1159_v36 }
 0xbd6   :  { %v1162_v23 = vpack.c.bf16 %v1161_v42, %v1161_v42 }
 0xbd8   :  { %2111 = vmatmul.mubr.msk.bf16.vlgmr.msra.gmra.mrb[28].mxu1 %vm296_vm2, %v1162_v23 }
 0xbd9   :  { %1363 = vmatpush1.bf16.msra.mxu1 %v2961_v25  ;;  %1394 = vmatprep.mubr.bf16.mxu1 %v2486_v1 }
 0xbda   :  { %1364 = vmatprep.subr.bf16.mxu1 %v2968_v31 }
 0xbdd   :  { %1365 = vmatpush1.bf16.msra.mxu1 %v2974_v5 }
 0xbde   :  { %1366 = vmatprep.subr.bf16.mxu1 %v2980_v39 }
 0xbe1   :  { %1367 = vmatpush1.bf16.msra.mxu1 %v2986_v38  ;;  %v1235_v16 = vpop.permute.xlu0 %1234 }
 0xbe2   :  { %1368 = vmatprep.subr.bf16.mxu1 %v2992_v61  ;;  %v1237_v11 = vmul.f32 %v2321_v8, %v1235_v16 }
 0xbe4   :  { %v1238_v46 = vpack.c.bf16 %v1237_v11, %v1237_v11 }
 0xbe5   :  { %1369 = vmatpush1.bf16.msra.mxu1 %v2998_v10 }
 0xbe6   :  { %1483 = vmatprep.subr.bf16.mxu1 %v2653_v41  ;;  %2112 = vmatmul.mubr.msk.bf16.vlgmr.msra.gmra.mrb[40].mxu0 %vm296_vm2, %v1238_v46  ;;  %v3023_v41 = vld [vmem:[%s3197_s3 + $0x4] ss:$8 sps:$4 sm:$0xff]  }
 0xbe7   :  { %1440 = vmatpush1.bf16.msra.mxu0 %v2659_v44  ;;  %1471 = vmatprep.mubr.bf16.mxu0 %v2486_v1 }
 0xbe8   :  { %2115 = vmatmul.mubr.msk.bf16.vlgmr.msra.gmra.mrb[32].mxu1 %vm296_vm2, %v1238_v46  ;;  %1441 = vmatprep.subr.bf16.mxu0 %v2661_v45 }
 0xbe9   :  { %1484 = vmatpush1.bf16.msra.mxu1 %v2657_v43  ;;  %1515 = vmatprep.mubr.bf16.mxu1 %v2486_v1  ;;  %v3026_v43 = vld [vmem:[#allocation6 + $0x4] ss:$8 sps:$4 sm:$0xff]  }
 0xbea   :  { %1485 = vmatprep.subr.bf16.mxu1 %v2668_v47 }
 0xbeb   :  { %1442 = vmatpush1.bf16.msra.mxu0 %v2672_v48 }
 0xbec   :  { %1443 = vmatprep.subr.bf16.mxu0 %v2678_v50  ;;  %v190_v50 = vadd.f32 %v2747_v21, %v2642_v24 }
 0xbed   :  { %1486 = vmatpush1.bf16.msra.mxu1 %v2674_v49  ;;  %v188_v49 = vadd.f32 %v2745_v20, %v2636_v22 }
 0xbee   :  { %1487 = vmatprep.subr.bf16.mxu1 %v2680_v51 }
 0xbef   :  { %1444 = vmatpush1.bf16.msra.mxu0 %v2686_v52 }
 0xbf0   :  { %1445 = vmatprep.subr.bf16.mxu0 %v2691_v54 }
 0xbf1   :  { %1488 = vmatpush1.bf16.msra.mxu1 %v2688_v53 }
 0xbf2   :  { %1489 = vmatprep.subr.bf16.mxu1 %v2697_v56 }
 0xbf3   :  { %1446 = vmatpush1.bf16.msra.mxu0 %v2700_v57 }
 0xbf4   :  { %1559 = vmatprep.subr.bf16.mxu0 %v3023_v41 }
 0xbf5   :  { %1490 = vmatpush1.bf16.msra.mxu1 %v2703_v58 }
 0xbf6   :  { %1636 = vmatprep.subr.bf16.mxu1 %v3026_v43 }
 0xcab   :  { %v1276_v44 = vpop.f32.mrb[28].mxu1 }
 0xcac   :  { %v1278_v45 = vpop.f32.mrb[29].mxu1 }
 0xcad   :  { %v1280_v47 = vpop.f32.mrb[30].mxu1 }
 0xcae   :  { %v1281_v48 = vpop.f32.mrb[31].mxu1 }
 0xcb9   :  { %v1320_v51 = vpop.f32.mrb[40].mxu0 }
 0xcba   :  { %v1321_v53 = vadd.f32 %v1320_v51, %v1276_v44  ;;  %v1322_v54 = vpop.f32.mrb[41].mxu0 }
 0xcbb   :  { %v1396_v52 = vpop.f32.mrb[32].mxu1  ;;  %v1323_v58 = vadd.f32 %v1322_v54, %v1278_v45  ;;  %v1324_v18 = vpop.f32.mrb[42].mxu0 }
 0xcbc   :  { %v1403_v56 = vadd.f32 %v1396_v52, %v188_v49  ;;  %v1398_v57 = vpop.f32.mrb[33].mxu1  ;;  %v1325_v28 = vpop.f32.mrb[43].mxu0  ;;  %v1327_v55 = vadd.f32 %v1321_v53, %v2793_v19  ;;  %v3064_v18 = vld [vmem:[#allocation6 + $0x24] ss:$8 sps:$4 sm:$0xff]  }
 0xcbd   :  { %v1404_v15 = vadd.f32 %v1398_v57, %v190_v50  ;;  %v1400_v35 = vpop.f32.mrb[34].mxu1  ;;  %v1328_v62 = vadd.f32 %v1323_v58, %v2786_v60  ;;  %v3055_v57 = vld [vmem:[#allocation6 + $0x14] ss:$8 sps:$4 sm:$0xff]   ;;  %v3061_v58 = vld [vmem:[#allocation6 + $0x10] ss:$8 sps:$4 sm:$0xff]  }
 0xcbe   :  { %v1401_v40 = vpop.f32.mrb[35].mxu1  ;;  %v2116_v59 = vmul.f32 -1.442695, %v1403_v56  ;;  %v2113_v37 = vmul.f32 -1.442695, %v1327_v55 }
 0xcbf   :  { %2322 = vtanh.f32 %v1404_v15  ;;  %v2117_v11 = vmul.f32 -1.442695, %v1404_v15  ;;  %v3050_v56 = vld [vmem:[#allocation6] ss:$8 sps:$4 sm:$0xff]   ;;  %v3072_v35 = vld [vmem:[#allocation6 + $0x34] ss:$8 sps:$4 sm:$0xff]  }
 0xcc0   :  { %2324 = vtanh.f32 %v1328_v62  ;;  %v3069_v15 = vld [vmem:[#allocation6 + $0x20] ss:$8 sps:$4 sm:$0xff]   ;;  %v3077_v28 = vld [vmem:[#allocation6 + $0x30] ss:$8 sps:$4 sm:$0xff]   ;;  %v3082_v40 = vld [vmem:[#allocation4 + $0x4] ss:$8 sps:$4 sm:$0xff]  }
 0xcc1   :  { %2326 = vpow2.f32 %v2116_v59  ;;  %v3099_v55 = vld [vmem:[#allocation4 + $0x20] ss:$8 sps:$4 sm:$0xff]   ;;  %v3102_v59 = vld [vmem:[#allocation4 + $0x34] ss:$8 sps:$4 sm:$0xff]  }
 0xcc2   :  { %2328 = vpow2.f32 %v2113_v37  ;;  %v3105_v37 = vld [vmem:[#allocation4 + $0x30] ss:$8 sps:$4 sm:$0xff]  }
 0xcc9   :  { %v2323_v20 = vpop.eup %2322 }
 0xcca   :  { %1420 = vrot.lane.b32.xlu0 %v2323_v20, %s2487_s2  ;;  %v2325_v21 = vpop.eup %2324  ;;  %v3090_v20 = vld [vmem:[#allocation4 + $0x14] ss:$8 sps:$4 sm:$0xff]  }
 0xccb   :  { %1344 = vrot.lane.b32.xlu1 %v2325_v21, %s2487_s2  ;;  %v2327_v0 = vpop.eup %2326  ;;  %v3093_v21 = vld [vmem:[#allocation4 + $0x10] ss:$8 sps:$4 sm:$0xff]  }
 0xccc   :  { %v2329_v26 = vpop.eup %2328  ;;  %v1411_v3 = vadd.f32 1.0, %v2327_v0 }
 0xccd   :  { %v1335_v4 = vadd.f32 1.0, %v2329_v26 }
 0xcce   :  { %2330 = vrcp.f32 %v1411_v3 }
 0xccf   :  { %2332 = vrcp.f32 %v1335_v4 }
 0xcd8   :  { %v2331_v6 = vpop.eup %2330 }
 0xcd9   :  { %v2333_v7 = vpop.eup %2332  ;;  %v1418_v27 = vmul.f32 %v2331_v6, %v2953_v9  ;;  %v2114_v9 = vmul.f32 -1.442695, %v1328_v62  ;;  %v3086_v62 = vld [vmem:[#allocation4] ss:$8 sps:$4 sm:$0xff]  }
 0xcda   :  { %v1342_v42 = vmul.f32 %v2333_v7, %v2948_v2 }
 0xd3c   :  { %v1421_v12 = vpop.permute.xlu0 %1420 }
 0xd3d   :  { %v1423_v13 = vmul.f32 %v2331_v6, %v1421_v12  ;;  %v1345_v14 = vpop.permute.xlu1 %1344 }
 0xd3e   :  { %v1347_v63 = vmul.f32 %v2333_v7, %v1345_v14 }
 0xd3f   :  { %1425 = vrot.lane.b32.xlu0 %v1423_v13, %s2487_s2 }
 0xd40   :  { %1349 = vrot.lane.b32.xlu1 %v1347_v63, %s2487_s2 }
 0xdb1   :  { %v1426_v36 = vpop.permute.xlu0 %1425 }
 0xdb2   :  { %v3040_v29 = vadd.f32 %v1426_v36, %v1418_v27  ;;  %v1350_v23 = vpop.permute.xlu1 %1349  ;;  %v194_v36 = vadd.f32 %v2749_v30, %v2636_v22 }
 0xdb3   :  { %v3044_v17 = vadd.f32 %v1350_v23, %v1342_v42 }
 0xdb4   :  { %2334 = vtanh.f32 %v3040_v29 }
 0xdb5   :  { %2336 = vtanh.f32 %v3044_v17 }
 0xdb6   :  { %2338 = vpow2.f32 %v2117_v11 }
 0xdb7   :  { %2340 = vpow2.f32 %v2114_v9 }
 0xdbe   :  { %v2335_v8 = vpop.eup %2334 }
 0xdbf   :  { %1431 = vrot.lane.b32.xlu0 %v2335_v8, %s2487_s2  ;;  %v2337_v16 = vpop.eup %2336 }
 0xdc0   :  { %1355 = vrot.lane.b32.xlu1 %v2337_v16, %s2487_s2  ;;  %v2339_v46 = vpop.eup %2338 }
 0xdc1   :  { %v2341_v44 = vpop.eup %2340  ;;  %v1412_v2 = vadd.f32 1.0, %v2339_v46 }
 0xdc2   :  { %v1336_v45 = vadd.f32 1.0, %v2341_v44 }
 0xdc3   :  { %2342 = vrcp.f32 %v1412_v2 }
 0xdc4   :  { %2344 = vrcp.f32 %v1336_v45 }
 0xdcd   :  { %v2343_v47 = vpop.eup %2342 }
 0xdce   :  { %v2345_v50 = vpop.eup %2344 }
 0xe31   :  { %v1432_v48 = vpop.permute.xlu0 %1431 }
 0xe32   :  { %v1434_v49 = vmul.f32 %v2343_v47, %v1432_v48  ;;  %v1356_v51 = vpop.permute.xlu1 %1355 }
 0xe33   :  { %v1358_v53 = vmul.f32 %v2345_v50, %v1356_v51 }
 0xe34   :  { %v1435_v52 = vpack.c.bf16 %v1434_v49, %v1434_v49 }
 0xe35   :  { %v1359_v54 = vpack.c.bf16 %v1358_v53, %v1358_v53 }
 0xe36   :  { %2119 = vmatmul.mubr.msk.bf16.vlgmr.msra.gmra.mrb[36].mxu1 %vm296_vm2, %v1435_v52 }
 0xe37   :  { %1637 = vmatpush1.bf16.msra.mxu1 %v3050_v56  ;;  %1668 = vmatprep.mubr.bf16.mxu1 %v2486_v1 }
 0xe38   :  { %2118 = vmatmul.mubr.msk.bf16.vlgmr.msra.gmra.mrb[44].mxu0 %vm296_vm2, %v1359_v54  ;;  %1638 = vmatprep.subr.bf16.mxu1 %v3055_v57 }
 0xe39   :  { %1560 = vmatpush1.bf16.msra.mxu0 %v2961_v25  ;;  %1591 = vmatprep.mubr.bf16.mxu0 %v2486_v1 }
 0xe3a   :  { %1561 = vmatprep.subr.bf16.mxu0 %v2968_v31 }
 0xe3b   :  { %1639 = vmatpush1.bf16.msra.mxu1 %v3061_v58 }
 0xe3c   :  { %1640 = vmatprep.subr.bf16.mxu1 %v3064_v18 }
 0xe3d   :  { %1562 = vmatpush1.bf16.msra.mxu0 %v2974_v5 }
 0xe3e   :  { %1563 = vmatprep.subr.bf16.mxu0 %v2980_v39 }
 0xe3f   :  { %1641 = vmatpush1.bf16.msra.mxu1 %v3069_v15 }
 0xe40   :  { %1642 = vmatprep.subr.bf16.mxu1 %v3072_v35 }
 0xe41   :  { %1564 = vmatpush1.bf16.msra.mxu0 %v2986_v38 }
 0xe42   :  { %1565 = vmatprep.subr.bf16.mxu0 %v2992_v61 }
 0xe43   :  { %1643 = vmatpush1.bf16.msra.mxu1 %v3077_v28 }
 0xe44   :  { %1756 = vmatprep.subr.bf16.mxu1 %v3023_v41  ;;  %v3096_v41 = vld [vmem:[#allocation4 + $0x24] ss:$8 sps:$4 sm:$0xff]  }
 0xe45   :  { %1566 = vmatpush1.bf16.msra.mxu0 %v2998_v10 }
 0xe46   :  { %1680 = vmatprep.subr.bf16.mxu0 %v3082_v40 }
 0xe48   :  { %2122 = vmatmul.mubr.msk.bf16.vlgmr.msra.gmra.mrb[48].mxu0 %vm296_vm2, %v1435_v52 }
 0xe49   :  { %1681 = vmatpush1.bf16.msra.mxu0 %v3086_v62  ;;  %1712 = vmatprep.mubr.bf16.mxu0 %v2486_v1 }
 0xe4a   :  { %1682 = vmatprep.subr.bf16.mxu0 %v3090_v20 }
 0xe4d   :  { %1683 = vmatpush1.bf16.msra.mxu0 %v3093_v21 }
 0xe4e   :  { %1684 = vmatprep.subr.bf16.mxu0 %v3096_v41 }
 0xe51   :  { %1685 = vmatpush1.bf16.msra.mxu0 %v3099_v55 }
 0xe52   :  { %1686 = vmatprep.subr.bf16.mxu0 %v3102_v59 }
 0xe55   :  { %1687 = vmatpush1.bf16.msra.mxu0 %v3105_v37 }
 0xe56   :  { %1833 = vmatprep.subr.bf16.mxu0 %v3026_v43  ;;  %v196_v43 = vadd.f32 %v2751_v32, %v2642_v24 }
 0xf09   :  { %v1517_v0 = vpop.f32.mrb[36].mxu1 }
 0xf0a   :  { %v1519_v26 = vpop.f32.mrb[37].mxu1 }
 0xf0b   :  { %v1473_v3 = vpop.f32.mrb[44].mxu0  ;;  %v1521_v4 = vpop.f32.mrb[38].mxu1 }
 0xf0c   :  { %v1518_v6 = vadd.f32 %v1517_v0, %v1473_v3  ;;  %v1475_v12 = vpop.f32.mrb[45].mxu0  ;;  %v1522_v13 = vpop.f32.mrb[39].mxu1 }
 0xf0d   :  { %v1520_v7 = vadd.f32 %v1519_v26, %v1475_v12  ;;  %v1477_v14 = vpop.f32.mrb[46].mxu0 }
 0xf0e   :  { %v1478_v63 = vpop.f32.mrb[47].mxu0  ;;  %v1524_v2 = vadd.f32 %v1518_v6, %v2793_v19 }
 0xf0f   :  { %v1525_v27 = vadd.f32 %v1520_v7, %v2786_v60 }
 0xf10   :  { %v2120_v45 = vmul.f32 -1.442695, %v1524_v2 }
 0xf11   :  { %2346 = vtanh.f32 %v1525_v27  ;;  %v2121_v63 = vmul.f32 -1.442695, %v1525_v27 }
 0xf1b   :  { %v2347_v42 = vpop.eup %2346  ;;  %v1593_v23 = vpop.f32.mrb[48].mxu0 }
 0xf1c   :  { %v1600_v8 = vadd.f32 %v1593_v23, %v194_v36  ;;  %v1595_v16 = vpop.f32.mrb[49].mxu0  ;;  %1541 = vrot.lane.b32.xlu1 %v2347_v42, %s2487_s2 }
 0xf1d   :  { %v1601_v11 = vadd.f32 %v1595_v16, %v196_v43  ;;  %v1597_v9 = vpop.f32.mrb[50].mxu0 }
 0xf1e   :  { %v1598_v46 = vpop.f32.mrb[51].mxu0  ;;  %v2123_v48 = vmul.f32 -1.442695, %v1600_v8 }
 0xf1f   :  { %2348 = vtanh.f32 %v1601_v11  ;;  %v2124_v42 = vmul.f32 -1.442695, %v1601_v11 }
 0xf20   :  { %2350 = vpow2.f32 %v2120_v45 }
 0xf29   :  { %v2349_v44 = vpop.eup %2348 }
 0xf2a   :  { %1617 = vrot.lane.b32.xlu0 %v2349_v44, %s2487_s2  ;;  %v2351_v30 = vpop.eup %2350 }
 0xf2b   :  { %v1532_v47 = vadd.f32 1.0, %v2351_v30 }
 0xf2d   :  { %2352 = vrcp.f32 %v1532_v47 }
 0xf2e   :  { %2354 = vpow2.f32 %v2123_v48 }
 0xf37   :  { %v2353_v32 = vpop.eup %2352 }
 0xf38   :  { %v2355_v50 = vpop.eup %2354  ;;  %v1539_v26 = vmul.f32 %v2353_v32, %v3044_v17 }
 0xf39   :  { %v1608_v52 = vadd.f32 1.0, %v2355_v50 }
 0xf3b   :  { %2356 = vrcp.f32 %v1608_v52 }
 0xf45   :  { %v2357_v53 = vpop.eup %2356 }
 0xf46   :  { %v1615_v12 = vmul.f32 %v2357_v53, %v3040_v29 }
 0xf8e   :  { %v1542_v49 = vpop.permute.xlu1 %1541 }
 0xf8f   :  { %v1544_v51 = vmul.f32 %v2353_v32, %v1542_v49 }
 0xf91   :  { %1546 = vrot.lane.b32.xlu1 %v1544_v51, %s2487_s2 }
 0xf9c   :  { %v1618_v54 = vpop.permute.xlu0 %1617 }
 0xf9d   :  { %v1620_v0 = vmul.f32 %v2357_v53, %v1618_v54 }
 0xf9f   :  { %1622 = vrot.lane.b32.xlu0 %v1620_v0, %s2487_s2 }
0x1003   :  { %v1547_v3 = vpop.permute.xlu1 %1546 }
0x1004   :  { %v3120_v4 = vadd.f32 %v1547_v3, %v1539_v26 }
0x1006   :  { %2358 = vtanh.f32 %v3120_v4 }
0x1010   :  { %v2359_v6 = vpop.eup %2358 }
0x1011   :  { %1552 = vrot.lane.b32.xlu1 %v2359_v6, %s2487_s2  ;;  %v1623_v13 = vpop.permute.xlu0 %1622 }
0x1012   :  { %v3125_v7 = vadd.f32 %v1623_v13, %v1615_v12 }
0x1014   :  { %2360 = vtanh.f32 %v3125_v7 }
0x1015   :  { %2362 = vpow2.f32 %v2121_v63 }
0x101e   :  { %v2361_v14 = vpop.eup %2360 }
0x101f   :  { %1628 = vrot.lane.b32.xlu0 %v2361_v14, %s2487_s2  ;;  %v2363_v17 = vpop.eup %2362 }
0x1020   :  { %v1533_v36 = vadd.f32 1.0, %v2363_v17 }
0x1022   :  { %2364 = vrcp.f32 %v1533_v36 }
0x1023   :  { %2366 = vpow2.f32 %v2124_v42 }
0x102c   :  { %v2365_v43 = vpop.eup %2364 }
0x102d   :  { %v2367_v8 = vpop.eup %2366 }
0x102e   :  { %v1609_v9 = vadd.f32 1.0, %v2367_v8 }
0x1030   :  { %2368 = vrcp.f32 %v1609_v9 }
0x103a   :  { %v2369_v27 = vpop.eup %2368 }
0x1083   :  { %v1553_v23 = vpop.permute.xlu1 %1552 }
0x1084   :  { %v1555_v16 = vmul.f32 %v2365_v43, %v1553_v23 }
0x1086   :  { %v1556_v29 = vpack.c.bf16 %v1555_v16, %v1555_v16 }
0x1088   :  { %2125 = vmatmul.mubr.msk.bf16.vlgmr.msra.gmra.mrb[40].mxu1 %vm296_vm2, %v1556_v29 }
0x1089   :  { %1757 = vmatpush1.bf16.msra.mxu1 %v2961_v25  ;;  %1788 = vmatprep.mubr.bf16.mxu1 %v2486_v1 }
0x108a   :  { %1758 = vmatprep.subr.bf16.mxu1 %v2968_v31 }
0x108d   :  { %1759 = vmatpush1.bf16.msra.mxu1 %v2974_v5 }
0x108e   :  { %1760 = vmatprep.subr.bf16.mxu1 %v2980_v39 }
0x1091   :  { %1761 = vmatpush1.bf16.msra.mxu1 %v2986_v38  ;;  %v1629_v11 = vpop.permute.xlu0 %1628  ;;  %v198_v38 = vadd.f32 %v2753_v33, %v2636_v22 }
0x1092   :  { %1762 = vmatprep.subr.bf16.mxu1 %v2992_v61  ;;  %v1631_v46 = vmul.f32 %v2369_v27, %v1629_v11  ;;  %v200_v61 = vadd.f32 %v2755_v34, %v2642_v24 }
0x1094   :  { %v1632_v25 = vpack.c.bf16 %v1631_v46, %v1631_v46 }
0x1095   :  { %1763 = vmatpush1.bf16.msra.mxu1 %v2998_v10 }
0x1096   :  { %1877 = vmatprep.subr.bf16.mxu1 %v3082_v40  ;;  %2126 = vmatmul.mubr.msk.bf16.vlgmr.msra.gmra.mrb[52].mxu0 %vm296_vm2, %v1632_v25 }
0x1097   :  { %1834 = vmatpush1.bf16.msra.mxu0 %v3050_v56  ;;  %1865 = vmatprep.mubr.bf16.mxu0 %v2486_v1 }
0x1098   :  { %2129 = vmatmul.mubr.msk.bf16.vlgmr.msra.gmra.mrb[44].mxu1 %vm296_vm2, %v1632_v25  ;;  %1835 = vmatprep.subr.bf16.mxu0 %v3055_v57 }
0x1099   :  { %1878 = vmatpush1.bf16.msra.mxu1 %v3086_v62  ;;  %1909 = vmatprep.mubr.bf16.mxu1 %v2486_v1 }
0x109a   :  { %1879 = vmatprep.subr.bf16.mxu1 %v3090_v20 }
0x109b   :  { %1836 = vmatpush1.bf16.msra.mxu0 %v3061_v58 }
0x109c   :  { %1837 = vmatprep.subr.bf16.mxu0 %v3064_v18 }
0x109d   :  { %1880 = vmatpush1.bf16.msra.mxu1 %v3093_v21 }
0x109e   :  { %1881 = vmatprep.subr.bf16.mxu1 %v3096_v41 }
0x109f   :  { %1838 = vmatpush1.bf16.msra.mxu0 %v3069_v15 }
0x10a0   :  { %1839 = vmatprep.subr.bf16.mxu0 %v3072_v35 }
0x10a1   :  { %1882 = vmatpush1.bf16.msra.mxu1 %v3099_v55 }
0x10a2   :  { %1883 = vmatprep.subr.bf16.mxu1 %v3102_v59 }
0x10a3   :  { %1840 = vmatpush1.bf16.msra.mxu0 %v3077_v28 }
0x10a5   :  { %1884 = vmatpush1.bf16.msra.mxu1 %v3105_v37 }
0x115b   :  { %v1670_v1 = vpop.f32.mrb[40].mxu1 }
0x115c   :  { %v1672_v31 = vpop.f32.mrb[41].mxu1 }
0x115d   :  { %v1674_v5 = vpop.f32.mrb[42].mxu1 }
0x115e   :  { %v1675_v39 = vpop.f32.mrb[43].mxu1 }
0x1169   :  { %v1714_v10 = vpop.f32.mrb[52].mxu0 }
0x116a   :  { %v1715_v57 = vadd.f32 %v1714_v10, %v1670_v1  ;;  %v1716_v58 = vpop.f32.mrb[53].mxu0 }
0x116b   :  { %v1790_v56 = vpop.f32.mrb[44].mxu1  ;;  %v1717_v35 = vadd.f32 %v1716_v58, %v1672_v31  ;;  %v1718_v28 = vpop.f32.mrb[54].mxu0 }
0x116c   :  { %v1797_v18 = vadd.f32 %v1790_v56, %v198_v38  ;;  %v1792_v15 = vpop.f32.mrb[45].mxu1  ;;  %v1719_v20 = vpop.f32.mrb[55].mxu0  ;;  %v1721_v33 = vadd.f32 %v1715_v57, %v2793_v19  ;;  %v2488_v28 = vmov 0.0  }
0x116d   :  { %v1798_v40 = vadd.f32 %v1792_v15, %v200_v61  ;;  %v1794_v62 = vpop.f32.mrb[46].mxu1  ;;  %v1722_v41 = vadd.f32 %v1717_v35, %v2786_v60  ;;  %2148 = vmatprep.subr.bf16.mxu0 %v2488_v28 }
0x116e   :  { %v1795_v21 = vpop.f32.mrb[47].mxu1  ;;  %v2130_v34 = vmul.f32 -1.442695, %v1797_v18  ;;  %v2127_v55 = vmul.f32 -1.442695, %v1721_v33 }
0x116f   :  { %2370 = vtanh.f32 %v1798_v40  ;;  %v2131_v6 = vmul.f32 -1.442695, %v1798_v40  ;;  %v2128_v12 = vmul.f32 -1.442695, %v1722_v41  ;;  %v2212_v40 = vld [vmem:[%s3201_s7 + $0x10] sm:$0xff]  }
0x1170   :  { %2372 = vtanh.f32 %v1722_v41  ;;  %v2213_v41 = vld [vmem:[%s3201_s7 + $0x18] sm:$0xff]  }
0x1171   :  { %2374 = vpow2.f32 %v2130_v34 }
0x1172   :  { %2376 = vpow2.f32 %v2127_v55 }
0x1179   :  { %v2371_v22 = vpop.eup %2370 }
0x117a   :  { %1814 = vrot.lane.b32.xlu0 %v2371_v22, %s2487_s2  ;;  %v2373_v24 = vpop.eup %2372 }
0x117b   :  { %1738 = vrot.lane.b32.xlu1 %v2373_v24, %s2487_s2  ;;  %v2375_v59 = vpop.eup %2374 }
0x117c   :  { %v2377_v37 = vpop.eup %2376  ;;  %v1805_v44 = vadd.f32 1.0, %v2375_v59 }
0x117d   :  { %v1729_v2 = vadd.f32 1.0, %v2377_v37 }
0x117e   :  { %2378 = vrcp.f32 %v1805_v44 }
0x117f   :  { %2380 = vrcp.f32 %v1729_v2  ;;  %v2136_v2 = vld [vmem:[#allocation3] ss:$0 sm:$0xff] }
0x1188   :  { %v2379_v45 = vpop.eup %2378 }
0x1189   :  { %v2381_v48 = vpop.eup %2380  ;;  %v1812_v50 = vmul.f32 %v2379_v45, %v3125_v7 }
0x118a   :  { %v1736_v53 = vmul.f32 %v2381_v48, %v3120_v4 }
0x11ec   :  { %v1815_v30 = vpop.permute.xlu0 %1814 }
0x11ed   :  { %v1817_v47 = vmul.f32 %v2379_v45, %v1815_v30  ;;  %v1739_v32 = vpop.permute.xlu1 %1738 }
0x11ee   :  { %v1741_v49 = vmul.f32 %v2381_v48, %v1739_v32 }
0x11ef   :  { %1819 = vrot.lane.b32.xlu0 %v1817_v47, %s2487_s2 }
0x11f0   :  { %1743 = vrot.lane.b32.xlu1 %v1741_v49, %s2487_s2 }
0x1261   :  { %v1820_v51 = vpop.permute.xlu0 %1819 }
0x1262   :  { %v1822_v52 = vadd.f32 %v1820_v51, %v1812_v50  ;;  %v1744_v54 = vpop.permute.xlu1 %1743 }
0x1263   :  { %v1746_v0 = vadd.f32 %v1744_v54, %v1736_v53 }
0x1264   :  { %2382 = vtanh.f32 %v1822_v52 }
0x1265   :  { %2384 = vtanh.f32 %v1746_v0 }
0x1266   :  { %2386 = vpow2.f32 %v2131_v6 }
0x1267   :  { %2388 = vpow2.f32 %v2128_v12 }
0x126e   :  { %v2383_v26 = vpop.eup %2382 }
0x126f   :  { %1825 = vrot.lane.b32.xlu0 %v2383_v26, %s2487_s2  ;;  %v2385_v3 = vpop.eup %2384 }
0x1270   :  { %1749 = vrot.lane.b32.xlu1 %v2385_v3, %s2487_s2  ;;  %v2387_v13 = vpop.eup %2386 }
0x1271   :  { %v2389_v7 = vpop.eup %2388  ;;  %v1806_v14 = vadd.f32 1.0, %v2387_v13 }
0x1272   :  { %v1730_v63 = vadd.f32 1.0, %v2389_v7 }
0x1273   :  { %2390 = vrcp.f32 %v1806_v14 }
0x1274   :  { %2392 = vrcp.f32 %v1730_v63 }
0x127d   :  { %v2391_v4 = vpop.eup %2390 }
0x127e   :  { %v2393_v42 = vpop.eup %2392 }
0x12e1   :  { %v1826_v17 = vpop.permute.xlu0 %1825 }
0x12e2   :  { %v1828_v36 = vmul.f32 %v2391_v4, %v1826_v17  ;;  %v1750_v43 = vpop.permute.xlu1 %1749 }
0x12e3   :  { %v1752_v8 = vmul.f32 %v2393_v42, %v1750_v43 }
0x12e4   :  { %v1829_v23 = vpack.c.bf16 %v1828_v36, %v1828_v36 }
0x12e5   :  { %v1753_v16 = vpack.c.bf16 %v1752_v8, %v1752_v8 }
0x12e6   :  { %2133 = vmatmul.mubr.msk.bf16.vlgmr.msra.gmra.mrb[48].mxu1 %vm296_vm2, %v1829_v23 }
0x12e7   :  { %2132 = vmatmul.mubr.msk.bf16.vlgmr.msra.gmra.mrb[56].mxu0 %vm296_vm2, %v1753_v16 }
0x12e8   :  { %2156 = vmatprep.mubr.msk.bf16.mxu0 %vm2489_vm3, %v2488_v28 }
0x13b9   :  { %v1911_v29 = vpop.f32.mrb[48].mxu1 }
0x13ba   :  { %v1913_v9 = vpop.f32.mrb[49].mxu1  ;;  %v1867_v27 = vpop.f32.mrb[56].mxu0 }
0x13bb   :  { %v1915_v11 = vpop.f32.mrb[50].mxu1  ;;  %v1912_v46 = vadd.f32 %v1911_v29, %v1867_v27  ;;  %v1869_v25 = vpop.f32.mrb[57].mxu0 }
0x13bc   :  { %v1916_v1 = vpop.f32.mrb[51].mxu1  ;;  %v1914_v31 = vadd.f32 %v1913_v9, %v1869_v25  ;;  %v1871_v5 = vpop.f32.mrb[58].mxu0 }
0x13bd   :  { %v1872_v39 = vpop.f32.mrb[59].mxu0  ;;  %v1918_v10 = vadd.f32 %v1912_v46, %v2793_v19  ;;  %v2211_v19 = vld [vmem:[%s3201_s7 + $0x8] sm:$0xff]  }
0x13be   :  { %v1919_v38 = vadd.f32 %v1914_v31, %v2786_v60  ;;  %v2210_v60 = vld [vmem:[%s3201_s7] sm:$0xff]  }
0x13bf   :  { %v2134_v56 = vmul.f32 -1.442695, %v1918_v10  ;;  %2149 = vmatpush3.bf16.msra.mxu0 %v2210_v60 }
0x13c0   :  { %2394 = vtanh.f32 %v1919_v38  ;;  %2150 = vmatprep.subr.bf16.mxu0 %v2488_v28  ;;  %v2135_v24 = vmul.f32 -1.442695, %v1919_v38 }
0x13c1   :  { %2396 = vpow2.f32 %v2134_v56 }
0x13c3   :  { %2151 = vmatpush3.bf16.msra.mxu0 %v2211_v19 }
0x13c4   :  { %2152 = vmatprep.subr.bf16.mxu0 %v2488_v28 }
0x13c7   :  { %2153 = vmatpush3.bf16.msra.mxu0 %v2212_v40 }
0x13c8   :  { %2154 = vmatprep.subr.bf16.mxu0 %v2488_v28 }
0x13ca   :  { %v2395_v61 = vpop.eup %2394 }
0x13cb   :  { %1935 = vrot.lane.b32.xlu1 %v2395_v61, %s2487_s2  ;;  %v2397_v57 = vpop.eup %2396  ;;  %2155 = vmatpush3.bf16.msra.mxu0 %v2213_v41 }
0x13cc   :  { %v1926_v58 = vadd.f32 1.0, %v2397_v57 }
0x13ce   :  { %2398 = vrcp.f32 %v1926_v58 }
0x13d8   :  { %v2399_v18 = vpop.eup %2398 }
0x13d9   :  { %v1933_v62 = vmul.f32 %v2399_v18, %v1746_v0 }
0x143d   :  { %v1936_v15 = vpop.permute.xlu1 %1935 }
0x143e   :  { %v1938_v35 = vmul.f32 %v2399_v18, %v1936_v15 }
0x1440   :  { %1940 = vrot.lane.b32.xlu0 %v1938_v35, %s2487_s2 }
0x14b2   :  { %v1941_v20 = vpop.permute.xlu0 %1940 }
0x14b3   :  { %v1943_v21 = vadd.f32 %v1941_v20, %v1933_v62 }
0x14b5   :  { %2400 = vtanh.f32 %v1943_v21 }
0x14b6   :  { %2402 = vpow2.f32 %v2135_v24 }
0x14bf   :  { %v2401_v22 = vpop.eup %2400 }
0x14c0   :  { %1946 = vrot.lane.b32.xlu1 %v2401_v22, %s2487_s2  ;;  %v2403_v33 = vpop.eup %2402 }
0x14c1   :  { %v1927_v34 = vadd.f32 1.0, %v2403_v33 }
0x14c3   :  { %2404 = vrcp.f32 %v1927_v34 }
0x14cd   :  { %v2405_v55 = vpop.eup %2404 }
0x1532   :  { %v1947_v59 = vpop.permute.xlu1 %1946 }
0x1533   :  { %v1949_v37 = vmul.f32 %v2405_v55, %v1947_v59 }
0x1535   :  { %v1950_v44 = vpack.c.bf16 %v1949_v37, %v1949_v37 }
0x1537   :  { %2157 = vmatmul.mubr.msk.bf16.vlgmr.msra.gmra.mrb[60].mxu0 %vm296_vm2, %v1950_v44 }
0x160a   :  { %v2027_v45 = vpop.f32.mrb[60].mxu0 }
0x160b   :  { %v2028_v30 = vadd.f32 %v2136_v2, %v2027_v45  ;;  %v2158_v47 = vpop.f32.mrb[61].mxu0 }
0x160c   :  { %v2030_v48 = vpop.f32.mrb[62].mxu0 }
0x160d   :  { %v2142_v32 = vmul.f32 -1.442695, %v2028_v30  ;;  %v2159_v49 = vpop.f32.mrb[63].mxu0 }
0x160f   :  { %2406 = vpow2.f32 %v2142_v32 }
0x1619   :  { %v2407_v50 = vpop.eup %2406 }
0x161a   :  { %v2036_v51 = vadd.f32 1.0, %v2407_v50 }
0x161c   :  { %2408 = vrcp.f32 %v2036_v51 }
0x1626   :  { %v2409_v52 = vpop.eup %2408 }
0x1627   :  { %2040 = vst.msk [vmem:[%s3203_s9] sm:$0xff] %vm2039_vm4, %v2409_v52 }
0x1628   :  { %2045 = vsyncpa [#allocation5], 1 }
0x1629   :  { %2046 = vsyncpa [#allocation7], 1 }

</bundles_post_ra>
